<compile_context>
chip_gen: v7x
topology: tpu7x:2x2x1
jax: 0.10.0
libtpu: 0.0.40
codegen_flags: <defaults>
</compile_context>

<pallas_src>
import jax
import jax.numpy as jnp
from jax import lax
from jax.experimental import pallas as pl
from jax.experimental.pallas import tpu as pltpu


def _round_up(v, m):
    return ((v + m - 1) // m) * m


def _largest_divisor_leq(n, cap):
    cap = max(1, min(n, cap))
    for d in range(cap, 0, -1):
        if n % d == 0:
            return d
    return 1


def _make_lstm_kernel(TC, BT, H, E, F, unroll):
    """Kernel factory; TC, BT, H, E, F, unroll are static Python values."""

    def split_gates(gates, width):
        i_g = jax.nn.sigmoid(gates[:, 0 * width:1 * width])
        f_g = jax.nn.sigmoid(gates[:, 1 * width:2 * width])
        g_g = jnp.tanh(gates[:, 2 * width:3 * width])
        o_g = jax.nn.sigmoid(gates[:, 3 * width:4 * width])
        return i_g, f_g, g_g, o_g

    def kernel(x_ref, w1x_ref, b1_ref, w1h_ref, wih2_ref, whh2_ref, b2_ref,
               hid_ref, xw_ref, h1_ref, c1_ref, h2_ref, c2_ref):
        # x_ref   : (TC*BT, F)  time-major rows for this batch tile / time chunk
        # w1x_ref : (F, 4H)     b1_ref: (1, 4H)
        # w1h_ref : (H, 4H)     bf16
        # wih2_ref: (H, 4E)     whh2_ref: (E, 4E)   both bf16    b2_ref: (1, 4E)
        # hid_ref : (BT, E)     final h2 of this batch tile (written on last chunk)
        # xw_ref  : (TC*BT, 4H) scratch: x @ W_ih1 + b1 for this chunk
        # h1/c1/h2/c2_ref: state carried across time-chunk grid iterations
        tc = pl.program_id(1)

        @pl.when(tc == 0)
        def _():
            h1_ref[...] = jnp.zeros_like(h1_ref)
            c1_ref[...] = jnp.zeros_like(c1_ref)
            h2_ref[...] = jnp.zeros_like(h2_ref)
            c2_ref[...] = jnp.zeros_like(c2_ref)

        # --- layer-1 input projection for the whole chunk (off the serial chain) ---
        if F == 1:
            # K=1: VPU broadcast-multiply instead of a degenerate MXU matmul.
            xw_ref[...] = x_ref[...] * w1x_ref[...] + b1_ref[...]
        else:
            xw_ref[...] = (
                jnp.dot(x_ref[...], w1x_ref[...], preferred_element_type=jnp.float32)
                + b1_ref[...])

        def step(t, carry):
            h1, c1, h2, c2 = carry

            # Layer-2 recurrent dot first: depends only on h2(t-1), hides under layer 1.
            g2_hh = jnp.dot(h2.astype(jnp.bfloat16), whh2_ref[...],
                            preferred_element_type=jnp.float32)

            # ----- layer 1: only the recurrent matmul is on the serial chain -----
            row = pl.multiple_of(t * BT, BT)
            gates1 = xw_ref[pl.ds(row, BT), :] + jnp.dot(
                h1.astype(jnp.bfloat16), w1h_ref[...],
                preferred_element_type=jnp.float32)
            i1, f1, g1, o1 = split_gates(gates1, H)
            c1 = f1 * c1 + i1 * g1
            h1 = o1 * jnp.tanh(c1)

            # ----- layer 2: add the h1-dependent half + cheap per-step bias broadcast -----
            gates2 = (g2_hh
                      + jnp.dot(h1.astype(jnp.bfloat16), wih2_ref[...],
                                preferred_element_type=jnp.float32)
                      + b2_ref[...])
            i2, f2, g2, o2 = split_gates(gates2, E)
            c2 = f2 * c2 + i2 * g2
            h2 = o2 * jnp.tanh(c2)
            return h1, c1, h2, c2

        init = (h1_ref[...], c1_ref[...], h2_ref[...], c2_ref[...])
        h1, c1, h2, c2 = lax.fori_loop(0, TC, step, init, unroll=unroll)
        h1_ref[...] = h1
        c1_ref[...] = c1
        h2_ref[...] = h2
        c2_ref[...] = c2

        @pl.when(tc == pl.num_programs(1) - 1)
        def _():
            hid_ref[...] = h2

    return kernel


def init_lstm_encoder_params(key, n_features, embedding_dim):
    """Deterministic init mimicking PyTorch nn.LSTM defaults: U(-1/sqrt(H), 1/sqrt(H))."""
    hidden_dim = 2 * embedding_dim
    ks = jax.random.split(key, 8)

    def u(k, shape, hid):
        bound = 1.0 / jnp.sqrt(jnp.float32(hid))
        return jax.random.uniform(k, shape, jnp.float32, -bound, bound)

    return dict(
        # lstm1: n_features -> hidden_dim
        w_ih1=u(ks[0], (4 * hidden_dim, n_features), hidden_dim),
        w_hh1=u(ks[1], (4 * hidden_dim, hidden_dim), hidden_dim),
        b_ih1=u(ks[2], (4 * hidden_dim,), hidden_dim),
        b_hh1=u(ks[3], (4 * hidden_dim,), hidden_dim),
        # lstm2: hidden_dim -> embedding_dim
        w_ih2=u(ks[4], (4 * embedding_dim, hidden_dim), embedding_dim),
        w_hh2=u(ks[5], (4 * embedding_dim, embedding_dim), embedding_dim),
        b_ih2=u(ks[6], (4 * embedding_dim,), embedding_dim),
        b_hh2=u(ks[7], (4 * embedding_dim,), embedding_dim),
    )


def lstm_encoder_forward(x, params):
    """x: (batch, seq_len, n_features) -> hidden_n: (1, batch, embedding_dim)."""
    B, S, F = x.shape
    H = params["w_hh1"].shape[1]
    E = params["w_hh2"].shape[1]

    # ---- batch tiling: BT is the M dim of every matmul; keep it as large as possible ----
    BT = min(128, _round_up(max(B, 1), 8))
    Bp = _round_up(max(B, 1), BT)
    n_bt = Bp // BT
    # TODO(synk): on v7x (2 TensorCores) halve BT when 16 <= B <= 128 so the "parallel"
    # batch-tile axis spans both cores; needs a reliable trace-time core-count query
    # (splitting unconditionally would double wall clock on single-core v5e/v6e).

    # ---- time chunking: bound the per-chunk working set well under 32 MiB VMEM ----
    def lane(v):
        return _round_up(max(v, 1), 128)

    bytes_per_step = 4 * BT * (2 * lane(F) + lane(4 * H))   # 2x x buffers + xw scratch
    tc_cap = max(1, (12 * 1024 * 1024) // bytes_per_step)
    TC = _largest_divisor_leq(S, tc_cap)                    # TC divides S exactly
    n_tc = S // TC
    unroll = True if TC <= 8 else 8

    # ---- input layout: per batch tile, time-major rows [t0 b0..b(BT-1), t1 b0.., ...] ----
    x = x.astype(jnp.float32)
    x_p = jnp.pad(x, ((0, Bp - B), (0, 0), (0, 0)))                     # (Bp, S, F)
    x_bt = (x_p.reshape(n_bt, BT, S, F)
                .transpose(0, 2, 1, 3)
                .reshape(n_bt, S * BT, F))                              # (n_bt, S*BT, F)
    # TODO(synk): when F is tiny (F=1 here), pack x with batch on lanes instead of the
    # lane-sparse (rows, 1) layout to cut the padded x-tile footprint in VMEM.

    # ---- weights: PyTorch (4*hid, in) -> (in, 4*hid); gate order [i,f,g,o] preserved ----
    # Recurrent / layer-2 weights in bf16 (MXU-native); accumulation stays f32.
    w1x = params["w_ih1"].T                                             # (F, 4H)
    b1 = (params["b_ih1"] + params["b_hh1"])[None, :].astype(jnp.float32)   # (1, 4H)
    w1h = params["w_hh1"].T.astype(jnp.bfloat16)                        # (H, 4H)
    wih2 = params["w_ih2"].T.astype(jnp.bfloat16)                       # (H, 4E)
    whh2 = params["w_hh2"].T.astype(jnp.bfloat16)                       # (E, 4E)
    b2 = (params["b_ih2"] + params["b_hh2"])[None, :].astype(jnp.float32)   # (1, 4E)
    if F == 1:
        w1x = w1x.astype(jnp.float32)        # VPU broadcast-multiply path stays f32
    else:
        w1x = w1x.astype(jnp.bfloat16)
        x_bt = x_bt.astype(jnp.bfloat16)

    kernel = _make_lstm_kernel(TC, BT, H, E, F, unroll)

    hid = pl.pallas_call(
        kernel,
        out_shape=jax.ShapeDtypeStruct((n_bt, BT, E), jnp.float32),
        grid=(n_bt, n_tc),                                              # time chunks last
        in_specs=[
            pl.BlockSpec((None, TC * BT, F), lambda j, t: (j, t, 0)),   # x, per chunk
            pl.BlockSpec((F, 4 * H), lambda j, t: (0, 0)),              # W_ih1^T
            pl.BlockSpec((1, 4 * H), lambda j, t: (0, 0)),              # b_ih1 + b_hh1
            pl.BlockSpec((H, 4 * H), lambda j, t: (0, 0)),              # W_hh1^T (bf16)
            pl.BlockSpec((H, 4 * E), lambda j, t: (0, 0)),              # W_ih2^T (bf16)
            pl.BlockSpec((E, 4 * E), lambda j, t: (0, 0)),              # W_hh2^T (bf16)
            pl.BlockSpec((1, 4 * E), lambda j, t: (0, 0)),              # b_ih2 + b_hh2
        ],
        out_specs=pl.BlockSpec((None, BT, E), lambda j, t: (j, 0, 0)),  # written on last chunk
        scratch_shapes=[
            pltpu.VMEM((TC * BT, 4 * H), jnp.float32),                  # xW1 + b1 per chunk
            pltpu.VMEM((BT, H), jnp.float32),                           # h1 carry
            pltpu.VMEM((BT, H), jnp.float32),                           # c1 carry
            pltpu.VMEM((BT, E), jnp.float32),                           # h2 carry
            pltpu.VMEM((BT, E), jnp.float32),                           # c2 carry
        ],
        compiler_params=pltpu.CompilerParams(
            dimension_semantics=("parallel", "arbitrary"),
            vmem_limit_bytes=32 * 1024 * 1024),
    )(x_bt, w1x, b1, w1h, wih2, whh2, b2)

    hid = hid.reshape(Bp, E)[:B, :]
    return hid[None, :, :]                                              # (1, B, E) like hidden_n


def lstm_encoder_reference(x, params):
    """Pure-JAX reference (lax.scan) matching PyTorch LSTM semantics, for validation."""
    def cell(x_t, h, c, w_ih, w_hh, b_ih, b_hh, hid):
        gates = x_t @ w_ih.T + h @ w_hh.T + b_ih + b_hh
        i_g = jax.nn.sigmoid(gates[:, 0 * hid:1 * hid])
        f_g = jax.nn.sigmoid(gates[:, 1 * hid:2 * hid])
        g_g = jnp.tanh(gates[:, 2 * hid:3 * hid])
        o_g = jax.nn.sigmoid(gates[:, 3 * hid:4 * hid])
        c_new = f_g * c + i_g * g_g
        return o_g * jnp.tanh(c_new), c_new

    B = x.shape[0]
    H = params["w_hh1"].shape[1]
    E = params["w_hh2"].shape[1]

    def scan_fn(carry, x_t):
        h1, c1, h2, c2 = carry
        h1, c1 = cell(x_t, h1, c1, params["w_ih1"], params["w_hh1"],
                      params["b_ih1"], params["b_hh1"], H)
        h2, c2 = cell(h1, h2, c2, params["w_ih2"], params["w_hh2"],
                      params["b_ih2"], params["b_hh2"], E)
        return (h1, c1, h2, c2), None

    init = (jnp.zeros((B, H)), jnp.zeros((B, H)), jnp.zeros((B, E)), jnp.zeros((B, E)))
    (h1, c1, h2, c2), _ = lax.scan(scan_fn, init, jnp.transpose(x, (1, 0, 2)))
    return h2[None, :, :]


if __name__ == "__main__":
    # Small shapes consistent with the module: batch=2, seq_len=8, n_features=1, embedding_dim=32.
    batch, seq_len, n_features, embedding_dim = 2, 8, 1, 32

    key = jax.random.PRNGKey(0)
    k_param, k_x = jax.random.split(key)
    params = init_lstm_encoder_params(k_param, n_features, embedding_dim)
    x = jax.random.normal(k_x, (batch, seq_len, n_features), jnp.float32)

    hidden_n = jax.block_until_ready(lstm_encoder_forward(x, params))
    assert hidden_n.shape == (1, batch, embedding_dim), hidden_n.shape

    ref = jax.block_until_ready(lstm_encoder_reference(x, params))
    err = float(jnp.max(jnp.abs(hidden_n - ref)))
    # bf16 matmul operands in the recurrence => looser tolerance than pure f32.
    assert err < 5e-2, err

    print("KERNEL_OK")
</pallas_src>

<mosaic_0001>
module attributes {stable_mosaic.version = 11 : i64} {
  func.func @kernel(%arg0: i32, %arg1: i32, %arg2: memref<1x64x1xf32, #tpu.memory_space<vmem>>, %arg3: memref<1x256xf32, #tpu.memory_space<vmem>>, %arg4: memref<1x256xf32, #tpu.memory_space<vmem>>, %arg5: memref<64x256xbf16, #tpu.memory_space<vmem>>, %arg6: memref<64x128xbf16, #tpu.memory_space<vmem>>, %arg7: memref<32x128xbf16, #tpu.memory_space<vmem>>, %arg8: memref<1x128xf32, #tpu.memory_space<vmem>>, %arg9: memref<1x8x32xf32, #tpu.memory_space<vmem>>, %arg10: memref<64x256xf32, #tpu.memory_space<vmem>>, %arg11: memref<8x64xf32, #tpu.memory_space<vmem>>, %arg12: memref<8x64xf32, #tpu.memory_space<vmem>>, %arg13: memref<8x32xf32, #tpu.memory_space<vmem>>, %arg14: memref<8x32xf32, #tpu.memory_space<vmem>>) attributes {dimension_semantics = [#tpu.dimension_semantics<parallel>, #tpu.dimension_semantics<arbitrary>], iteration_bounds = array<i64: 1, 1>, scalar_prefetch = 0 : i64, scratch_operands = 5 : i64, tpu.core_type = #tpu.core_type<tc>, window_params = [{transform_indices = @transform_0, window_bounds = array<i64: 1, 64, 1>}, {pipeline_mode = #tpu.pipeline_mode<synchronous>, transform_indices = @transform_1, window_bounds = array<i64: 1, 256>}, {pipeline_mode = #tpu.pipeline_mode<synchronous>, transform_indices = @transform_2, window_bounds = array<i64: 1, 256>}, {pipeline_mode = #tpu.pipeline_mode<synchronous>, transform_indices = @transform_3, window_bounds = array<i64: 64, 256>}, {pipeline_mode = #tpu.pipeline_mode<synchronous>, transform_indices = @transform_4, window_bounds = array<i64: 64, 128>}, {pipeline_mode = #tpu.pipeline_mode<synchronous>, transform_indices = @transform_5, window_bounds = array<i64: 32, 128>}, {pipeline_mode = #tpu.pipeline_mode<synchronous>, transform_indices = @transform_6, window_bounds = array<i64: 1, 128>}, {transform_indices = @transform_7, window_bounds = array<i64: 1, 8, 32>}]} {
    %c0_i32 = arith.constant 0 : i32
    %0 = arith.cmpi eq, %arg1, %c0_i32 : i32
    %1 = arith.extui %0 : i1 to i32
    %c0_i32_0 = arith.constant 0 : i32
    %2 = arith.cmpi ne, %1, %c0_i32_0 : i32
    scf.if %2 {
      %cst_179 = arith.constant 0.000000e+00 : f32
      %568 = vector.broadcast %cst_179 : f32 to vector<8x64xf32>
      %c0_180 = arith.constant 0 : index
      %c0_181 = arith.constant 0 : index
      %569 = vector.load %arg11[%c0_180, %c0_181] : memref<8x64xf32, #tpu.memory_space<vmem>>, vector<8x64xf32>
      tpu.vector_store %arg11[%c0_180, %c0_181], %568 {strides = array<i32>} : memref<8x64xf32, #tpu.memory_space<vmem>>, vector<8x64xf32>,
      %cst_182 = arith.constant 0.000000e+00 : f32
      %570 = vector.broadcast %cst_182 : f32 to vector<8x64xf32>
      %c0_183 = arith.constant 0 : index
      %c0_184 = arith.constant 0 : index
      %571 = vector.load %arg12[%c0_183, %c0_184] : memref<8x64xf32, #tpu.memory_space<vmem>>, vector<8x64xf32>
      tpu.vector_store %arg12[%c0_183, %c0_184], %570 {strides = array<i32>} : memref<8x64xf32, #tpu.memory_space<vmem>>, vector<8x64xf32>,
      %cst_185 = arith.constant 0.000000e+00 : f32
      %572 = vector.broadcast %cst_185 : f32 to vector<8x32xf32>
      %c0_186 = arith.constant 0 : index
      %c0_187 = arith.constant 0 : index
      %573 = vector.load %arg13[%c0_186, %c0_187] : memref<8x32xf32, #tpu.memory_space<vmem>>, vector<8x32xf32>
      tpu.vector_store %arg13[%c0_186, %c0_187], %572 {strides = array<i32>} : memref<8x32xf32, #tpu.memory_space<vmem>>, vector<8x32xf32>,
      %cst_188 = arith.constant 0.000000e+00 : f32
      %574 = vector.broadcast %cst_188 : f32 to vector<8x32xf32>
      %c0_189 = arith.constant 0 : index
      %c0_190 = arith.constant 0 : index
      %575 = vector.load %arg14[%c0_189, %c0_190] : memref<8x32xf32, #tpu.memory_space<vmem>>, vector<8x32xf32>
      tpu.vector_store %arg14[%c0_189, %c0_190], %574 {strides = array<i32>} : memref<8x32xf32, #tpu.memory_space<vmem>>, vector<8x32xf32>,
    } else {
    }
    %c0 = arith.constant 0 : index
    %c0_1 = arith.constant 0 : index
    %c0_2 = arith.constant 0 : index
    %3 = vector.load %arg2[%c0, %c0_1, %c0_2] : memref<1x64x1xf32, #tpu.memory_space<vmem>>, vector<1x64x1xf32>
    %4 = vector.shape_cast %3 : vector<1x64x1xf32> to vector<64x1xf32>
    %c0_3 = arith.constant 0 : index
    %c0_4 = arith.constant 0 : index
    %5 = vector.load %arg3[%c0_3, %c0_4] : memref<1x256xf32, #tpu.memory_space<vmem>>, vector<1x256xf32>
    %6 = vector.broadcast %4 : vector<64x1xf32> to vector<64x256xf32>
    %7 = vector.broadcast %5 : vector<1x256xf32> to vector<64x256xf32>
    %8 = arith.mulf %6, %7 : vector<64x256xf32>
    %c0_5 = arith.constant 0 : index
    %c0_6 = arith.constant 0 : index
    %9 = vector.load %arg4[%c0_5, %c0_6] : memref<1x256xf32, #tpu.memory_space<vmem>>, vector<1x256xf32>
    %10 = vector.broadcast %9 : vector<1x256xf32> to vector<64x256xf32>
    %11 = arith.addf %8, %10 : vector<64x256xf32>
    %c0_7 = arith.constant 0 : index
    %c0_8 = arith.constant 0 : index
    %12 = vector.load %arg10[%c0_7, %c0_8] : memref<64x256xf32, #tpu.memory_space<vmem>>, vector<64x256xf32>
    tpu.vector_store %arg10[%c0_7, %c0_8], %11 {strides = array<i32>} : memref<64x256xf32, #tpu.memory_space<vmem>>, vector<64x256xf32>,
    %c0_9 = arith.constant 0 : index
    %c0_10 = arith.constant 0 : index
    %13 = vector.load %arg11[%c0_9, %c0_10] : memref<8x64xf32, #tpu.memory_space<vmem>>, vector<8x64xf32>
    %c0_11 = arith.constant 0 : index
    %c0_12 = arith.constant 0 : index
    %14 = vector.load %arg12[%c0_11, %c0_12] : memref<8x64xf32, #tpu.memory_space<vmem>>, vector<8x64xf32>
    %c0_13 = arith.constant 0 : index
    %c0_14 = arith.constant 0 : index
    %15 = vector.load %arg13[%c0_13, %c0_14] : memref<8x32xf32, #tpu.memory_space<vmem>>, vector<8x32xf32>
    %c0_15 = arith.constant 0 : index
    %c0_16 = arith.constant 0 : index
    %16 = vector.load %arg14[%c0_15, %c0_16] : memref<8x32xf32, #tpu.memory_space<vmem>>, vector<8x32xf32>
    %c0_i32_17 = arith.constant 0 : i32
    %17 = arith.truncf %15 : vector<8x32xf32> to vector<8x32xbf16>
    %c0_18 = arith.constant 0 : index
    %c0_19 = arith.constant 0 : index
    %18 = vector.load %arg7[%c0_18, %c0_19] : memref<32x128xbf16, #tpu.memory_space<vmem>>, vector<32x128xbf16>
    %cst = arith.constant dense<0.000000e+00> : vector<8x128xf32>
    %19 = tpu.matmul %17, %18, %cst {dimension_numbers = #tpu.dot_dimension_numbers<[1], [0], [0], [1], [0, 0, 1, 1], [], []>} : vector<8x32xbf16>, vector<32x128xbf16>, vector<8x128xf32> -> vector<8x128xf32>
    %c8_i32 = arith.constant 8 : i32
    %20 = arith.muli %c0_i32_17, %c8_i32 : i32
    %21 = tpu.assume_multiple %20, 8 : i32
    %22 = arith.index_cast %21 : i32 to index
    %c0_20 = arith.constant 0 : index
    %23 = vector.load %arg10[%22, %c0_20] : memref<64x256xf32, #tpu.memory_space<vmem>>, vector<8x256xf32>
    %24 = arith.truncf %13 : vector<8x64xf32> to vector<8x64xbf16>
    %c0_21 = arith.constant 0 : index
    %c0_22 = arith.constant 0 : index
    %25 = vector.load %arg5[%c0_21, %c0_22] : memref<64x256xbf16, #tpu.memory_space<vmem>>, vector<64x256xbf16>
    %cst_23 = arith.constant dense<0.000000e+00> : vector<8x256xf32>
    %26 = tpu.matmul %24, %25, %cst_23 {dimension_numbers = #tpu.dot_dimension_numbers<[1], [0], [0], [1], [0, 0, 1, 1], [], []>} : vector<8x64xbf16>, vector<64x256xbf16>, vector<8x256xf32> -> vector<8x256xf32>
    %27 = arith.addf %23, %26 : vector<8x256xf32>
    %28 = vector.extract_strided_slice %27 {offsets = [0, 0], sizes = [8, 64], strides = [1, 1]} : vector<8x256xf32> to vector<8x64xf32>
    %29 = arith.negf %28 : vector<8x64xf32>
    %30 = math.exp %29 : vector<8x64xf32>
    %cst_24 = arith.constant 1.000000e+00 : f32
    %31 = vector.broadcast %cst_24 : f32 to vector<8x64xf32>
    %32 = arith.addf %31, %30 : vector<8x64xf32>
    %33 = arith.divf %31, %32 : vector<8x64xf32>
    %34 = vector.extract_strided_slice %27 {offsets = [0, 64], sizes = [8, 64], strides = [1, 1]} : vector<8x256xf32> to vector<8x64xf32>
    %35 = arith.negf %34 : vector<8x64xf32>
    %36 = math.exp %35 : vector<8x64xf32>
    %cst_25 = arith.constant 1.000000e+00 : f32
    %37 = vector.broadcast %cst_25 : f32 to vector<8x64xf32>
    %38 = arith.addf %37, %36 : vector<8x64xf32>
    %39 = arith.divf %37, %38 : vector<8x64xf32>
    %40 = vector.extract_strided_slice %27 {offsets = [0, 128], sizes = [8, 64], strides = [1, 1]} : vector<8x256xf32> to vector<8x64xf32>
    %41 = math.tanh %40 : vector<8x64xf32>
    %42 = vector.extract_strided_slice %27 {offsets = [0, 192], sizes = [8, 64], strides = [1, 1]} : vector<8x256xf32> to vector<8x64xf32>
    %43 = arith.negf %42 : vector<8x64xf32>
    %44 = math.exp %43 : vector<8x64xf32>
    %cst_26 = arith.constant 1.000000e+00 : f32
    %45 = vector.broadcast %cst_26 : f32 to vector<8x64xf32>
    %46 = arith.addf %45, %44 : vector<8x64xf32>
    %47 = arith.divf %45, %46 : vector<8x64xf32>
    %48 = arith.mulf %39, %14 : vector<8x64xf32>
    %49 = arith.mulf %33, %41 : vector<8x64xf32>
    %50 = arith.addf %48, %49 : vector<8x64xf32>
    %51 = math.tanh %50 : vector<8x64xf32>
    %52 = arith.mulf %47, %51 : vector<8x64xf32>
    %53 = arith.truncf %52 : vector<8x64xf32> to vector<8x64xbf16>
    %c0_27 = arith.constant 0 : index
    %c0_28 = arith.constant 0 : index
    %54 = vector.load %arg6[%c0_27, %c0_28] : memref<64x128xbf16, #tpu.memory_space<vmem>>, vector<64x128xbf16>
    %cst_29 = arith.constant dense<0.000000e+00> : vector<8x128xf32>
    %55 = tpu.matmul %53, %54, %cst_29 {dimension_numbers = #tpu.dot_dimension_numbers<[1], [0], [0], [1], [0, 0, 1, 1], [], []>} : vector<8x64xbf16>, vector<64x128xbf16>, vector<8x128xf32> -> vector<8x128xf32>
    %56 = arith.addf %19, %55 : vector<8x128xf32>
    %c0_30 = arith.constant 0 : index
    %c0_31 = arith.constant 0 : index
    %57 = vector.load %arg8[%c0_30, %c0_31] : memref<1x128xf32, #tpu.memory_space<vmem>>, vector<1x128xf32>
    %58 = vector.broadcast %57 : vector<1x128xf32> to vector<8x128xf32>
    %59 = arith.addf %56, %58 : vector<8x128xf32>
    %60 = vector.extract_strided_slice %59 {offsets = [0, 0], sizes = [8, 32], strides = [1, 1]} : vector<8x128xf32> to vector<8x32xf32>
    %61 = arith.negf %60 : vector<8x32xf32>
    %62 = math.exp %61 : vector<8x32xf32>
    %cst_32 = arith.constant 1.000000e+00 : f32
    %63 = vector.broadcast %cst_32 : f32 to vector<8x32xf32>
    %64 = arith.addf %63, %62 : vector<8x32xf32>
    %65 = arith.divf %63, %64 : vector<8x32xf32>
    %66 = vector.extract_strided_slice %59 {offsets = [0, 32], sizes = [8, 32], strides = [1, 1]} : vector<8x128xf32> to vector<8x32xf32>
    %67 = arith.negf %66 : vector<8x32xf32>
    %68 = math.exp %67 : vector<8x32xf32>
    %cst_33 = arith.constant 1.000000e+00 : f32
    %69 = vector.broadcast %cst_33 : f32 to vector<8x32xf32>
    %70 = arith.addf %69, %68 : vector<8x32xf32>
    %71 = arith.divf %69, %70 : vector<8x32xf32>
    %72 = vector.extract_strided_slice %59 {offsets = [0, 64], sizes = [8, 32], strides = [1, 1]} : vector<8x128xf32> to vector<8x32xf32>
    %73 = math.tanh %72 : vector<8x32xf32>
    %74 = vector.extract_strided_slice %59 {offsets = [0, 96], sizes = [8, 32], strides = [1, 1]} : vector<8x128xf32> to vector<8x32xf32>
    %75 = arith.negf %74 : vector<8x32xf32>
    %76 = math.exp %75 : vector<8x32xf32>
    %cst_34 = arith.constant 1.000000e+00 : f32
    %77 = vector.broadcast %cst_34 : f32 to vector<8x32xf32>
    %78 = arith.addf %77, %76 : vector<8x32xf32>
    %79 = arith.divf %77, %78 : vector<8x32xf32>
    %80 = arith.mulf %71, %16 : vector<8x32xf32>
    %81 = arith.mulf %65, %73 : vector<8x32xf32>
    %82 = arith.addf %80, %81 : vector<8x32xf32>
    %83 = math.tanh %82 : vector<8x32xf32>
    %84 = arith.mulf %79, %83 : vector<8x32xf32>
    %c1_i32 = arith.constant 1 : i32
    %85 = arith.truncf %84 : vector<8x32xf32> to vector<8x32xbf16>
    %c0_35 = arith.constant 0 : index
    %c0_36 = arith.constant 0 : index
    %86 = vector.load %arg7[%c0_35, %c0_36] : memref<32x128xbf16, #tpu.memory_space<vmem>>, vector<32x128xbf16>
    %cst_37 = arith.constant dense<0.000000e+00> : vector<8x128xf32>
    %87 = tpu.matmul %85, %86, %cst_37 {dimension_numbers = #tpu.dot_dimension_numbers<[1], [0], [0], [1], [0, 0, 1, 1], [], []>} : vector<8x32xbf16>, vector<32x128xbf16>, vector<8x128xf32> -> vector<8x128xf32>
    %c8_i32_38 = arith.constant 8 : i32
    %88 = arith.muli %c1_i32, %c8_i32_38 : i32
    %89 = tpu.assume_multiple %88, 8 : i32
    %90 = arith.index_cast %89 : i32 to index
    %c0_39 = arith.constant 0 : index
    %91 = vector.load %arg10[%90, %c0_39] : memref<64x256xf32, #tpu.memory_space<vmem>>, vector<8x256xf32>
    %92 = arith.truncf %52 : vector<8x64xf32> to vector<8x64xbf16>
    %c0_40 = arith.constant 0 : index
    %c0_41 = arith.constant 0 : index
    %93 = vector.load %arg5[%c0_40, %c0_41] : memref<64x256xbf16, #tpu.memory_space<vmem>>, vector<64x256xbf16>
    %cst_42 = arith.constant dense<0.000000e+00> : vector<8x256xf32>
    %94 = tpu.matmul %92, %93, %cst_42 {dimension_numbers = #tpu.dot_dimension_numbers<[1], [0], [0], [1], [0, 0, 1, 1], [], []>} : vector<8x64xbf16>, vector<64x256xbf16>, vector<8x256xf32> -> vector<8x256xf32>
    %95 = arith.addf %91, %94 : vector<8x256xf32>
    %96 = vector.extract_strided_slice %95 {offsets = [0, 0], sizes = [8, 64], strides = [1, 1]} : vector<8x256xf32> to vector<8x64xf32>
    %97 = arith.negf %96 : vector<8x64xf32>
    %98 = math.exp %97 : vector<8x64xf32>
    %cst_43 = arith.constant 1.000000e+00 : f32
    %99 = vector.broadcast %cst_43 : f32 to vector<8x64xf32>
    %100 = arith.addf %99, %98 : vector<8x64xf32>
    %101 = arith.divf %99, %100 : vector<8x64xf32>
    %102 = vector.extract_strided_slice %95 {offsets = [0, 64], sizes = [8, 64], strides = [1, 1]} : vector<8x256xf32> to vector<8x64xf32>
    %103 = arith.negf %102 : vector<8x64xf32>
    %104 = math.exp %103 : vector<8x64xf32>
    %cst_44 = arith.constant 1.000000e+00 : f32
    %105 = vector.broadcast %cst_44 : f32 to vector<8x64xf32>
    %106 = arith.addf %105, %104 : vector<8x64xf32>
    %107 = arith.divf %105, %106 : vector<8x64xf32>
    %108 = vector.extract_strided_slice %95 {offsets = [0, 128], sizes = [8, 64], strides = [1, 1]} : vector<8x256xf32> to vector<8x64xf32>
    %109 = math.tanh %108 : vector<8x64xf32>
    %110 = vector.extract_strided_slice %95 {offsets = [0, 192], sizes = [8, 64], strides = [1, 1]} : vector<8x256xf32> to vector<8x64xf32>
    %111 = arith.negf %110 : vector<8x64xf32>
    %112 = math.exp %111 : vector<8x64xf32>
    %cst_45 = arith.constant 1.000000e+00 : f32
    %113 = vector.broadcast %cst_45 : f32 to vector<8x64xf32>
    %114 = arith.addf %113, %112 : vector<8x64xf32>
    %115 = arith.divf %113, %114 : vector<8x64xf32>
    %116 = arith.mulf %107, %50 : vector<8x64xf32>
    %117 = arith.mulf %101, %109 : vector<8x64xf32>
    %118 = arith.addf %116, %117 : vector<8x64xf32>
    %119 = math.tanh %118 : vector<8x64xf32>
    %120 = arith.mulf %115, %119 : vector<8x64xf32>
    %121 = arith.truncf %120 : vector<8x64xf32> to vector<8x64xbf16>
    %c0_46 = arith.constant 0 : index
    %c0_47 = arith.constant 0 : index
    %122 = vector.load %arg6[%c0_46, %c0_47] : memref<64x128xbf16, #tpu.memory_space<vmem>>, vector<64x128xbf16>
    %cst_48 = arith.constant dense<0.000000e+00> : vector<8x128xf32>
    %123 = tpu.matmul %121, %122, %cst_48 {dimension_numbers = #tpu.dot_dimension_numbers<[1], [0], [0], [1], [0, 0, 1, 1], [], []>} : vector<8x64xbf16>, vector<64x128xbf16>, vector<8x128xf32> -> vector<8x128xf32>
    %124 = arith.addf %87, %123 : vector<8x128xf32>
    %c0_49 = arith.constant 0 : index
    %c0_50 = arith.constant 0 : index
    %125 = vector.load %arg8[%c0_49, %c0_50] : memref<1x128xf32, #tpu.memory_space<vmem>>, vector<1x128xf32>
    %126 = vector.broadcast %125 : vector<1x128xf32> to vector<8x128xf32>
    %127 = arith.addf %124, %126 : vector<8x128xf32>
    %128 = vector.extract_strided_slice %127 {offsets = [0, 0], sizes = [8, 32], strides = [1, 1]} : vector<8x128xf32> to vector<8x32xf32>
    %129 = arith.negf %128 : vector<8x32xf32>
    %130 = math.exp %129 : vector<8x32xf32>
    %cst_51 = arith.constant 1.000000e+00 : f32
    %131 = vector.broadcast %cst_51 : f32 to vector<8x32xf32>
    %132 = arith.addf %131, %130 : vector<8x32xf32>
    %133 = arith.divf %131, %132 : vector<8x32xf32>
    %134 = vector.extract_strided_slice %127 {offsets = [0, 32], sizes = [8, 32], strides = [1, 1]} : vector<8x128xf32> to vector<8x32xf32>
    %135 = arith.negf %134 : vector<8x32xf32>
    %136 = math.exp %135 : vector<8x32xf32>
    %cst_52 = arith.constant 1.000000e+00 : f32
    %137 = vector.broadcast %cst_52 : f32 to vector<8x32xf32>
    %138 = arith.addf %137, %136 : vector<8x32xf32>
    %139 = arith.divf %137, %138 : vector<8x32xf32>
    %140 = vector.extract_strided_slice %127 {offsets = [0, 64], sizes = [8, 32], strides = [1, 1]} : vector<8x128xf32> to vector<8x32xf32>
    %141 = math.tanh %140 : vector<8x32xf32>
    %142 = vector.extract_strided_slice %127 {offsets = [0, 96], sizes = [8, 32], strides = [1, 1]} : vector<8x128xf32> to vector<8x32xf32>
    %143 = arith.negf %142 : vector<8x32xf32>
    %144 = math.exp %143 : vector<8x32xf32>
    %cst_53 = arith.constant 1.000000e+00 : f32
    %145 = vector.broadcast %cst_53 : f32 to vector<8x32xf32>
    %146 = arith.addf %145, %144 : vector<8x32xf32>
    %147 = arith.divf %145, %146 : vector<8x32xf32>
    %148 = arith.mulf %139, %82 : vector<8x32xf32>
    %149 = arith.mulf %133, %141 : vector<8x32xf32>
    %150 = arith.addf %148, %149 : vector<8x32xf32>
    %151 = math.tanh %150 : vector<8x32xf32>
    %152 = arith.mulf %147, %151 : vector<8x32xf32>
    %c2_i32 = arith.constant 2 : i32
    %153 = arith.truncf %152 : vector<8x32xf32> to vector<8x32xbf16>
    %c0_54 = arith.constant 0 : index
    %c0_55 = arith.constant 0 : index
    %154 = vector.load %arg7[%c0_54, %c0_55] : memref<32x128xbf16, #tpu.memory_space<vmem>>, vector<32x128xbf16>
    %cst_56 = arith.constant dense<0.000000e+00> : vector<8x128xf32>
    %155 = tpu.matmul %153, %154, %cst_56 {dimension_numbers = #tpu.dot_dimension_numbers<[1], [0], [0], [1], [0, 0, 1, 1], [], []>} : vector<8x32xbf16>, vector<32x128xbf16>, vector<8x128xf32> -> vector<8x128xf32>
    %c8_i32_57 = arith.constant 8 : i32
    %156 = arith.muli %c2_i32, %c8_i32_57 : i32
    %157 = tpu.assume_multiple %156, 8 : i32
    %158 = arith.index_cast %157 : i32 to index
    %c0_58 = arith.constant 0 : index
    %159 = vector.load %arg10[%158, %c0_58] : memref<64x256xf32, #tpu.memory_space<vmem>>, vector<8x256xf32>
    %160 = arith.truncf %120 : vector<8x64xf32> to vector<8x64xbf16>
    %c0_59 = arith.constant 0 : index
    %c0_60 = arith.constant 0 : index
    %161 = vector.load %arg5[%c0_59, %c0_60] : memref<64x256xbf16, #tpu.memory_space<vmem>>, vector<64x256xbf16>
    %cst_61 = arith.constant dense<0.000000e+00> : vector<8x256xf32>
    %162 = tpu.matmul %160, %161, %cst_61 {dimension_numbers = #tpu.dot_dimension_numbers<[1], [0], [0], [1], [0, 0, 1, 1], [], []>} : vector<8x64xbf16>, vector<64x256xbf16>, vector<8x256xf32> -> vector<8x256xf32>
    %163 = arith.addf %159, %162 : vector<8x256xf32>
    %164 = vector.extract_strided_slice %163 {offsets = [0, 0], sizes = [8, 64], strides = [1, 1]} : vector<8x256xf32> to vector<8x64xf32>
    %165 = arith.negf %164 : vector<8x64xf32>
    %166 = math.exp %165 : vector<8x64xf32>
    %cst_62 = arith.constant 1.000000e+00 : f32
    %167 = vector.broadcast %cst_62 : f32 to vector<8x64xf32>
    %168 = arith.addf %167, %166 : vector<8x64xf32>
    %169 = arith.divf %167, %168 : vector<8x64xf32>
    %170 = vector.extract_strided_slice %163 {offsets = [0, 64], sizes = [8, 64], strides = [1, 1]} : vector<8x256xf32> to vector<8x64xf32>
    %171 = arith.negf %170 : vector<8x64xf32>
    %172 = math.exp %171 : vector<8x64xf32>
    %cst_63 = arith.constant 1.000000e+00 : f32
    %173 = vector.broadcast %cst_63 : f32 to vector<8x64xf32>
    %174 = arith.addf %173, %172 : vector<8x64xf32>
    %175 = arith.divf %173, %174 : vector<8x64xf32>
    %176 = vector.extract_strided_slice %163 {offsets = [0, 128], sizes = [8, 64], strides = [1, 1]} : vector<8x256xf32> to vector<8x64xf32>
    %177 = math.tanh %176 : vector<8x64xf32>
    %178 = vector.extract_strided_slice %163 {offsets = [0, 192], sizes = [8, 64], strides = [1, 1]} : vector<8x256xf32> to vector<8x64xf32>
    %179 = arith.negf %178 : vector<8x64xf32>
    %180 = math.exp %179 : vector<8x64xf32>
    %cst_64 = arith.constant 1.000000e+00 : f32
    %181 = vector.broadcast %cst_64 : f32 to vector<8x64xf32>
    %182 = arith.addf %181, %180 : vector<8x64xf32>
    %183 = arith.divf %181, %182 : vector<8x64xf32>
    %184 = arith.mulf %175, %118 : vector<8x64xf32>
    %185 = arith.mulf %169, %177 : vector<8x64xf32>
    %186 = arith.addf %184, %185 : vector<8x64xf32>
    %187 = math.tanh %186 : vector<8x64xf32>
    %188 = arith.mulf %183, %187 : vector<8x64xf32>
    %189 = arith.truncf %188 : vector<8x64xf32> to vector<8x64xbf16>
    %c0_65 = arith.constant 0 : index
    %c0_66 = arith.constant 0 : index
    %190 = vector.load %arg6[%c0_65, %c0_66] : memref<64x128xbf16, #tpu.memory_space<vmem>>, vector<64x128xbf16>
    %cst_67 = arith.constant dense<0.000000e+00> : vector<8x128xf32>
    %191 = tpu.matmul %189, %190, %cst_67 {dimension_numbers = #tpu.dot_dimension_numbers<[1], [0], [0], [1], [0, 0, 1, 1], [], []>} : vector<8x64xbf16>, vector<64x128xbf16>, vector<8x128xf32> -> vector<8x128xf32>
    %192 = arith.addf %155, %191 : vector<8x128xf32>
    %c0_68 = arith.constant 0 : index
    %c0_69 = arith.constant 0 : index
    %193 = vector.load %arg8[%c0_68, %c0_69] : memref<1x128xf32, #tpu.memory_space<vmem>>, vector<1x128xf32>
    %194 = vector.broadcast %193 : vector<1x128xf32> to vector<8x128xf32>
    %195 = arith.addf %192, %194 : vector<8x128xf32>
    %196 = vector.extract_strided_slice %195 {offsets = [0, 0], sizes = [8, 32], strides = [1, 1]} : vector<8x128xf32> to vector<8x32xf32>
    %197 = arith.negf %196 : vector<8x32xf32>
    %198 = math.exp %197 : vector<8x32xf32>
    %cst_70 = arith.constant 1.000000e+00 : f32
    %199 = vector.broadcast %cst_70 : f32 to vector<8x32xf32>
    %200 = arith.addf %199, %198 : vector<8x32xf32>
    %201 = arith.divf %199, %200 : vector<8x32xf32>
    %202 = vector.extract_strided_slice %195 {offsets = [0, 32], sizes = [8, 32], strides = [1, 1]} : vector<8x128xf32> to vector<8x32xf32>
    %203 = arith.negf %202 : vector<8x32xf32>
    %204 = math.exp %203 : vector<8x32xf32>
    %cst_71 = arith.constant 1.000000e+00 : f32
    %205 = vector.broadcast %cst_71 : f32 to vector<8x32xf32>
    %206 = arith.addf %205, %204 : vector<8x32xf32>
    %207 = arith.divf %205, %206 : vector<8x32xf32>
    %208 = vector.extract_strided_slice %195 {offsets = [0, 64], sizes = [8, 32], strides = [1, 1]} : vector<8x128xf32> to vector<8x32xf32>
    %209 = math.tanh %208 : vector<8x32xf32>
    %210 = vector.extract_strided_slice %195 {offsets = [0, 96], sizes = [8, 32], strides = [1, 1]} : vector<8x128xf32> to vector<8x32xf32>
    %211 = arith.negf %210 : vector<8x32xf32>
    %212 = math.exp %211 : vector<8x32xf32>
    %cst_72 = arith.constant 1.000000e+00 : f32
    %213 = vector.broadcast %cst_72 : f32 to vector<8x32xf32>
    %214 = arith.addf %213, %212 : vector<8x32xf32>
    %215 = arith.divf %213, %214 : vector<8x32xf32>
    %216 = arith.mulf %207, %150 : vector<8x32xf32>
    %217 = arith.mulf %201, %209 : vector<8x32xf32>
    %218 = arith.addf %216, %217 : vector<8x32xf32>
    %219 = math.tanh %218 : vector<8x32xf32>
    %220 = arith.mulf %215, %219 : vector<8x32xf32>
    %c3_i32 = arith.constant 3 : i32
    %221 = arith.truncf %220 : vector<8x32xf32> to vector<8x32xbf16>
    %c0_73 = arith.constant 0 : index
    %c0_74 = arith.constant 0 : index
    %222 = vector.load %arg7[%c0_73, %c0_74] : memref<32x128xbf16, #tpu.memory_space<vmem>>, vector<32x128xbf16>
    %cst_75 = arith.constant dense<0.000000e+00> : vector<8x128xf32>
    %223 = tpu.matmul %221, %222, %cst_75 {dimension_numbers = #tpu.dot_dimension_numbers<[1], [0], [0], [1], [0, 0, 1, 1], [], []>} : vector<8x32xbf16>, vector<32x128xbf16>, vector<8x128xf32> -> vector<8x128xf32>
    %c8_i32_76 = arith.constant 8 : i32
    %224 = arith.muli %c3_i32, %c8_i32_76 : i32
    %225 = tpu.assume_multiple %224, 8 : i32
    %226 = arith.index_cast %225 : i32 to index
    %c0_77 = arith.constant 0 : index
    %227 = vector.load %arg10[%226, %c0_77] : memref<64x256xf32, #tpu.memory_space<vmem>>, vector<8x256xf32>
    %228 = arith.truncf %188 : vector<8x64xf32> to vector<8x64xbf16>
    %c0_78 = arith.constant 0 : index
    %c0_79 = arith.constant 0 : index
    %229 = vector.load %arg5[%c0_78, %c0_79] : memref<64x256xbf16, #tpu.memory_space<vmem>>, vector<64x256xbf16>
    %cst_80 = arith.constant dense<0.000000e+00> : vector<8x256xf32>
    %230 = tpu.matmul %228, %229, %cst_80 {dimension_numbers = #tpu.dot_dimension_numbers<[1], [0], [0], [1], [0, 0, 1, 1], [], []>} : vector<8x64xbf16>, vector<64x256xbf16>, vector<8x256xf32> -> vector<8x256xf32>
    %231 = arith.addf %227, %230 : vector<8x256xf32>
    %232 = vector.extract_strided_slice %231 {offsets = [0, 0], sizes = [8, 64], strides = [1, 1]} : vector<8x256xf32> to vector<8x64xf32>
    %233 = arith.negf %232 : vector<8x64xf32>
    %234 = math.exp %233 : vector<8x64xf32>
    %cst_81 = arith.constant 1.000000e+00 : f32
    %235 = vector.broadcast %cst_81 : f32 to vector<8x64xf32>
    %236 = arith.addf %235, %234 : vector<8x64xf32>
    %237 = arith.divf %235, %236 : vector<8x64xf32>
    %238 = vector.extract_strided_slice %231 {offsets = [0, 64], sizes = [8, 64], strides = [1, 1]} : vector<8x256xf32> to vector<8x64xf32>
    %239 = arith.negf %238 : vector<8x64xf32>
    %240 = math.exp %239 : vector<8x64xf32>
    %cst_82 = arith.constant 1.000000e+00 : f32
    %241 = vector.broadcast %cst_82 : f32 to vector<8x64xf32>
    %242 = arith.addf %241, %240 : vector<8x64xf32>
    %243 = arith.divf %241, %242 : vector<8x64xf32>
    %244 = vector.extract_strided_slice %231 {offsets = [0, 128], sizes = [8, 64], strides = [1, 1]} : vector<8x256xf32> to vector<8x64xf32>
    %245 = math.tanh %244 : vector<8x64xf32>
    %246 = vector.extract_strided_slice %231 {offsets = [0, 192], sizes = [8, 64], strides = [1, 1]} : vector<8x256xf32> to vector<8x64xf32>
    %247 = arith.negf %246 : vector<8x64xf32>
    %248 = math.exp %247 : vector<8x64xf32>
    %cst_83 = arith.constant 1.000000e+00 : f32
    %249 = vector.broadcast %cst_83 : f32 to vector<8x64xf32>
    %250 = arith.addf %249, %248 : vector<8x64xf32>
    %251 = arith.divf %249, %250 : vector<8x64xf32>
    %252 = arith.mulf %243, %186 : vector<8x64xf32>
    %253 = arith.mulf %237, %245 : vector<8x64xf32>
    %254 = arith.addf %252, %253 : vector<8x64xf32>
    %255 = math.tanh %254 : vector<8x64xf32>
    %256 = arith.mulf %251, %255 : vector<8x64xf32>
    %257 = arith.truncf %256 : vector<8x64xf32> to vector<8x64xbf16>
    %c0_84 = arith.constant 0 : index
    %c0_85 = arith.constant 0 : index
    %258 = vector.load %arg6[%c0_84, %c0_85] : memref<64x128xbf16, #tpu.memory_space<vmem>>, vector<64x128xbf16>
    %cst_86 = arith.constant dense<0.000000e+00> : vector<8x128xf32>
    %259 = tpu.matmul %257, %258, %cst_86 {dimension_numbers = #tpu.dot_dimension_numbers<[1], [0], [0], [1], [0, 0, 1, 1], [], []>} : vector<8x64xbf16>, vector<64x128xbf16>, vector<8x128xf32> -> vector<8x128xf32>
    %260 = arith.addf %223, %259 : vector<8x128xf32>
    %c0_87 = arith.constant 0 : index
    %c0_88 = arith.constant 0 : index
    %261 = vector.load %arg8[%c0_87, %c0_88] : memref<1x128xf32, #tpu.memory_space<vmem>>, vector<1x128xf32>
    %262 = vector.broadcast %261 : vector<1x128xf32> to vector<8x128xf32>
    %263 = arith.addf %260, %262 : vector<8x128xf32>
    %264 = vector.extract_strided_slice %263 {offsets = [0, 0], sizes = [8, 32], strides = [1, 1]} : vector<8x128xf32> to vector<8x32xf32>
    %265 = arith.negf %264 : vector<8x32xf32>
    %266 = math.exp %265 : vector<8x32xf32>
    %cst_89 = arith.constant 1.000000e+00 : f32
    %267 = vector.broadcast %cst_89 : f32 to vector<8x32xf32>
    %268 = arith.addf %267, %266 : vector<8x32xf32>
    %269 = arith.divf %267, %268 : vector<8x32xf32>
    %270 = vector.extract_strided_slice %263 {offsets = [0, 32], sizes = [8, 32], strides = [1, 1]} : vector<8x128xf32> to vector<8x32xf32>
    %271 = arith.negf %270 : vector<8x32xf32>
    %272 = math.exp %271 : vector<8x32xf32>
    %cst_90 = arith.constant 1.000000e+00 : f32
    %273 = vector.broadcast %cst_90 : f32 to vector<8x32xf32>
    %274 = arith.addf %273, %272 : vector<8x32xf32>
    %275 = arith.divf %273, %274 : vector<8x32xf32>
    %276 = vector.extract_strided_slice %263 {offsets = [0, 64], sizes = [8, 32], strides = [1, 1]} : vector<8x128xf32> to vector<8x32xf32>
    %277 = math.tanh %276 : vector<8x32xf32>
    %278 = vector.extract_strided_slice %263 {offsets = [0, 96], sizes = [8, 32], strides = [1, 1]} : vector<8x128xf32> to vector<8x32xf32>
    %279 = arith.negf %278 : vector<8x32xf32>
    %280 = math.exp %279 : vector<8x32xf32>
    %cst_91 = arith.constant 1.000000e+00 : f32
    %281 = vector.broadcast %cst_91 : f32 to vector<8x32xf32>
    %282 = arith.addf %281, %280 : vector<8x32xf32>
    %283 = arith.divf %281, %282 : vector<8x32xf32>
    %284 = arith.mulf %275, %218 : vector<8x32xf32>
    %285 = arith.mulf %269, %277 : vector<8x32xf32>
    %286 = arith.addf %284, %285 : vector<8x32xf32>
    %287 = math.tanh %286 : vector<8x32xf32>
    %288 = arith.mulf %283, %287 : vector<8x32xf32>
    %c4_i32 = arith.constant 4 : i32
    %289 = arith.truncf %288 : vector<8x32xf32> to vector<8x32xbf16>
    %c0_92 = arith.constant 0 : index
    %c0_93 = arith.constant 0 : index
    %290 = vector.load %arg7[%c0_92, %c0_93] : memref<32x128xbf16, #tpu.memory_space<vmem>>, vector<32x128xbf16>
    %cst_94 = arith.constant dense<0.000000e+00> : vector<8x128xf32>
    %291 = tpu.matmul %289, %290, %cst_94 {dimension_numbers = #tpu.dot_dimension_numbers<[1], [0], [0], [1], [0, 0, 1, 1], [], []>} : vector<8x32xbf16>, vector<32x128xbf16>, vector<8x128xf32> -> vector<8x128xf32>
    %c8_i32_95 = arith.constant 8 : i32
    %292 = arith.muli %c4_i32, %c8_i32_95 : i32
    %293 = tpu.assume_multiple %292, 8 : i32
    %294 = arith.index_cast %293 : i32 to index
    %c0_96 = arith.constant 0 : index
    %295 = vector.load %arg10[%294, %c0_96] : memref<64x256xf32, #tpu.memory_space<vmem>>, vector<8x256xf32>
    %296 = arith.truncf %256 : vector<8x64xf32> to vector<8x64xbf16>
    %c0_97 = arith.constant 0 : index
    %c0_98 = arith.constant 0 : index
    %297 = vector.load %arg5[%c0_97, %c0_98] : memref<64x256xbf16, #tpu.memory_space<vmem>>, vector<64x256xbf16>
    %cst_99 = arith.constant dense<0.000000e+00> : vector<8x256xf32>
    %298 = tpu.matmul %296, %297, %cst_99 {dimension_numbers = #tpu.dot_dimension_numbers<[1], [0], [0], [1], [0, 0, 1, 1], [], []>} : vector<8x64xbf16>, vector<64x256xbf16>, vector<8x256xf32> -> vector<8x256xf32>
    %299 = arith.addf %295, %298 : vector<8x256xf32>
    %300 = vector.extract_strided_slice %299 {offsets = [0, 0], sizes = [8, 64], strides = [1, 1]} : vector<8x256xf32> to vector<8x64xf32>
    %301 = arith.negf %300 : vector<8x64xf32>
    %302 = math.exp %301 : vector<8x64xf32>
    %cst_100 = arith.constant 1.000000e+00 : f32
    %303 = vector.broadcast %cst_100 : f32 to vector<8x64xf32>
    %304 = arith.addf %303, %302 : vector<8x64xf32>
    %305 = arith.divf %303, %304 : vector<8x64xf32>
    %306 = vector.extract_strided_slice %299 {offsets = [0, 64], sizes = [8, 64], strides = [1, 1]} : vector<8x256xf32> to vector<8x64xf32>
    %307 = arith.negf %306 : vector<8x64xf32>
    %308 = math.exp %307 : vector<8x64xf32>
    %cst_101 = arith.constant 1.000000e+00 : f32
    %309 = vector.broadcast %cst_101 : f32 to vector<8x64xf32>
    %310 = arith.addf %309, %308 : vector<8x64xf32>
    %311 = arith.divf %309, %310 : vector<8x64xf32>
    %312 = vector.extract_strided_slice %299 {offsets = [0, 128], sizes = [8, 64], strides = [1, 1]} : vector<8x256xf32> to vector<8x64xf32>
    %313 = math.tanh %312 : vector<8x64xf32>
    %314 = vector.extract_strided_slice %299 {offsets = [0, 192], sizes = [8, 64], strides = [1, 1]} : vector<8x256xf32> to vector<8x64xf32>
    %315 = arith.negf %314 : vector<8x64xf32>
    %316 = math.exp %315 : vector<8x64xf32>
    %cst_102 = arith.constant 1.000000e+00 : f32
    %317 = vector.broadcast %cst_102 : f32 to vector<8x64xf32>
    %318 = arith.addf %317, %316 : vector<8x64xf32>
    %319 = arith.divf %317, %318 : vector<8x64xf32>
    %320 = arith.mulf %311, %254 : vector<8x64xf32>
    %321 = arith.mulf %305, %313 : vector<8x64xf32>
    %322 = arith.addf %320, %321 : vector<8x64xf32>
    %323 = math.tanh %322 : vector<8x64xf32>
    %324 = arith.mulf %319, %323 : vector<8x64xf32>
    %325 = arith.truncf %324 : vector<8x64xf32> to vector<8x64xbf16>
    %c0_103 = arith.constant 0 : index
    %c0_104 = arith.constant 0 : index
    %326 = vector.load %arg6[%c0_103, %c0_104] : memref<64x128xbf16, #tpu.memory_space<vmem>>, vector<64x128xbf16>
    %cst_105 = arith.constant dense<0.000000e+00> : vector<8x128xf32>
    %327 = tpu.matmul %325, %326, %cst_105 {dimension_numbers = #tpu.dot_dimension_numbers<[1], [0], [0], [1], [0, 0, 1, 1], [], []>} : vector<8x64xbf16>, vector<64x128xbf16>, vector<8x128xf32> -> vector<8x128xf32>
    %328 = arith.addf %291, %327 : vector<8x128xf32>
    %c0_106 = arith.constant 0 : index
    %c0_107 = arith.constant 0 : index
    %329 = vector.load %arg8[%c0_106, %c0_107] : memref<1x128xf32, #tpu.memory_space<vmem>>, vector<1x128xf32>
    %330 = vector.broadcast %329 : vector<1x128xf32> to vector<8x128xf32>
    %331 = arith.addf %328, %330 : vector<8x128xf32>
    %332 = vector.extract_strided_slice %331 {offsets = [0, 0], sizes = [8, 32], strides = [1, 1]} : vector<8x128xf32> to vector<8x32xf32>
    %333 = arith.negf %332 : vector<8x32xf32>
    %334 = math.exp %333 : vector<8x32xf32>
    %cst_108 = arith.constant 1.000000e+00 : f32
    %335 = vector.broadcast %cst_108 : f32 to vector<8x32xf32>
    %336 = arith.addf %335, %334 : vector<8x32xf32>
    %337 = arith.divf %335, %336 : vector<8x32xf32>
    %338 = vector.extract_strided_slice %331 {offsets = [0, 32], sizes = [8, 32], strides = [1, 1]} : vector<8x128xf32> to vector<8x32xf32>
    %339 = arith.negf %338 : vector<8x32xf32>
    %340 = math.exp %339 : vector<8x32xf32>
    %cst_109 = arith.constant 1.000000e+00 : f32
    %341 = vector.broadcast %cst_109 : f32 to vector<8x32xf32>
    %342 = arith.addf %341, %340 : vector<8x32xf32>
    %343 = arith.divf %341, %342 : vector<8x32xf32>
    %344 = vector.extract_strided_slice %331 {offsets = [0, 64], sizes = [8, 32], strides = [1, 1]} : vector<8x128xf32> to vector<8x32xf32>
    %345 = math.tanh %344 : vector<8x32xf32>
    %346 = vector.extract_strided_slice %331 {offsets = [0, 96], sizes = [8, 32], strides = [1, 1]} : vector<8x128xf32> to vector<8x32xf32>
    %347 = arith.negf %346 : vector<8x32xf32>
    %348 = math.exp %347 : vector<8x32xf32>
    %cst_110 = arith.constant 1.000000e+00 : f32
    %349 = vector.broadcast %cst_110 : f32 to vector<8x32xf32>
    %350 = arith.addf %349, %348 : vector<8x32xf32>
    %351 = arith.divf %349, %350 : vector<8x32xf32>
    %352 = arith.mulf %343, %286 : vector<8x32xf32>
    %353 = arith.mulf %337, %345 : vector<8x32xf32>
    %354 = arith.addf %352, %353 : vector<8x32xf32>
    %355 = math.tanh %354 : vector<8x32xf32>
    %356 = arith.mulf %351, %355 : vector<8x32xf32>
    %c5_i32 = arith.constant 5 : i32
    %357 = arith.truncf %356 : vector<8x32xf32> to vector<8x32xbf16>
    %c0_111 = arith.constant 0 : index
    %c0_112 = arith.constant 0 : index
    %358 = vector.load %arg7[%c0_111, %c0_112] : memref<32x128xbf16, #tpu.memory_space<vmem>>, vector<32x128xbf16>
    %cst_113 = arith.constant dense<0.000000e+00> : vector<8x128xf32>
    %359 = tpu.matmul %357, %358, %cst_113 {dimension_numbers = #tpu.dot_dimension_numbers<[1], [0], [0], [1], [0, 0, 1, 1], [], []>} : vector<8x32xbf16>, vector<32x128xbf16>, vector<8x128xf32> -> vector<8x128xf32>
    %c8_i32_114 = arith.constant 8 : i32
    %360 = arith.muli %c5_i32, %c8_i32_114 : i32
    %361 = tpu.assume_multiple %360, 8 : i32
    %362 = arith.index_cast %361 : i32 to index
    %c0_115 = arith.constant 0 : index
    %363 = vector.load %arg10[%362, %c0_115] : memref<64x256xf32, #tpu.memory_space<vmem>>, vector<8x256xf32>
    %364 = arith.truncf %324 : vector<8x64xf32> to vector<8x64xbf16>
    %c0_116 = arith.constant 0 : index
    %c0_117 = arith.constant 0 : index
    %365 = vector.load %arg5[%c0_116, %c0_117] : memref<64x256xbf16, #tpu.memory_space<vmem>>, vector<64x256xbf16>
    %cst_118 = arith.constant dense<0.000000e+00> : vector<8x256xf32>
    %366 = tpu.matmul %364, %365, %cst_118 {dimension_numbers = #tpu.dot_dimension_numbers<[1], [0], [0], [1], [0, 0, 1, 1], [], []>} : vector<8x64xbf16>, vector<64x256xbf16>, vector<8x256xf32> -> vector<8x256xf32>
    %367 = arith.addf %363, %366 : vector<8x256xf32>
    %368 = vector.extract_strided_slice %367 {offsets = [0, 0], sizes = [8, 64], strides = [1, 1]} : vector<8x256xf32> to vector<8x64xf32>
    %369 = arith.negf %368 : vector<8x64xf32>
    %370 = math.exp %369 : vector<8x64xf32>
    %cst_119 = arith.constant 1.000000e+00 : f32
    %371 = vector.broadcast %cst_119 : f32 to vector<8x64xf32>
    %372 = arith.addf %371, %370 : vector<8x64xf32>
    %373 = arith.divf %371, %372 : vector<8x64xf32>
    %374 = vector.extract_strided_slice %367 {offsets = [0, 64], sizes = [8, 64], strides = [1, 1]} : vector<8x256xf32> to vector<8x64xf32>
    %375 = arith.negf %374 : vector<8x64xf32>
    %376 = math.exp %375 : vector<8x64xf32>
    %cst_120 = arith.constant 1.000000e+00 : f32
    %377 = vector.broadcast %cst_120 : f32 to vector<8x64xf32>
    %378 = arith.addf %377, %376 : vector<8x64xf32>
    %379 = arith.divf %377, %378 : vector<8x64xf32>
    %380 = vector.extract_strided_slice %367 {offsets = [0, 128], sizes = [8, 64], strides = [1, 1]} : vector<8x256xf32> to vector<8x64xf32>
    %381 = math.tanh %380 : vector<8x64xf32>
    %382 = vector.extract_strided_slice %367 {offsets = [0, 192], sizes = [8, 64], strides = [1, 1]} : vector<8x256xf32> to vector<8x64xf32>
    %383 = arith.negf %382 : vector<8x64xf32>
    %384 = math.exp %383 : vector<8x64xf32>
    %cst_121 = arith.constant 1.000000e+00 : f32
    %385 = vector.broadcast %cst_121 : f32 to vector<8x64xf32>
    %386 = arith.addf %385, %384 : vector<8x64xf32>
    %387 = arith.divf %385, %386 : vector<8x64xf32>
    %388 = arith.mulf %379, %322 : vector<8x64xf32>
    %389 = arith.mulf %373, %381 : vector<8x64xf32>
    %390 = arith.addf %388, %389 : vector<8x64xf32>
    %391 = math.tanh %390 : vector<8x64xf32>
    %392 = arith.mulf %387, %391 : vector<8x64xf32>
    %393 = arith.truncf %392 : vector<8x64xf32> to vector<8x64xbf16>
    %c0_122 = arith.constant 0 : index
    %c0_123 = arith.constant 0 : index
    %394 = vector.load %arg6[%c0_122, %c0_123] : memref<64x128xbf16, #tpu.memory_space<vmem>>, vector<64x128xbf16>
    %cst_124 = arith.constant dense<0.000000e+00> : vector<8x128xf32>
    %395 = tpu.matmul %393, %394, %cst_124 {dimension_numbers = #tpu.dot_dimension_numbers<[1], [0], [0], [1], [0, 0, 1, 1], [], []>} : vector<8x64xbf16>, vector<64x128xbf16>, vector<8x128xf32> -> vector<8x128xf32>
    %396 = arith.addf %359, %395 : vector<8x128xf32>
    %c0_125 = arith.constant 0 : index
    %c0_126 = arith.constant 0 : index
    %397 = vector.load %arg8[%c0_125, %c0_126] : memref<1x128xf32, #tpu.memory_space<vmem>>, vector<1x128xf32>
    %398 = vector.broadcast %397 : vector<1x128xf32> to vector<8x128xf32>
    %399 = arith.addf %396, %398 : vector<8x128xf32>
    %400 = vector.extract_strided_slice %399 {offsets = [0, 0], sizes = [8, 32], strides = [1, 1]} : vector<8x128xf32> to vector<8x32xf32>
    %401 = arith.negf %400 : vector<8x32xf32>
    %402 = math.exp %401 : vector<8x32xf32>
    %cst_127 = arith.constant 1.000000e+00 : f32
    %403 = vector.broadcast %cst_127 : f32 to vector<8x32xf32>
    %404 = arith.addf %403, %402 : vector<8x32xf32>
    %405 = arith.divf %403, %404 : vector<8x32xf32>
    %406 = vector.extract_strided_slice %399 {offsets = [0, 32], sizes = [8, 32], strides = [1, 1]} : vector<8x128xf32> to vector<8x32xf32>
    %407 = arith.negf %406 : vector<8x32xf32>
    %408 = math.exp %407 : vector<8x32xf32>
    %cst_128 = arith.constant 1.000000e+00 : f32
    %409 = vector.broadcast %cst_128 : f32 to vector<8x32xf32>
    %410 = arith.addf %409, %408 : vector<8x32xf32>
    %411 = arith.divf %409, %410 : vector<8x32xf32>
    %412 = vector.extract_strided_slice %399 {offsets = [0, 64], sizes = [8, 32], strides = [1, 1]} : vector<8x128xf32> to vector<8x32xf32>
    %413 = math.tanh %412 : vector<8x32xf32>
    %414 = vector.extract_strided_slice %399 {offsets = [0, 96], sizes = [8, 32], strides = [1, 1]} : vector<8x128xf32> to vector<8x32xf32>
    %415 = arith.negf %414 : vector<8x32xf32>
    %416 = math.exp %415 : vector<8x32xf32>
    %cst_129 = arith.constant 1.000000e+00 : f32
    %417 = vector.broadcast %cst_129 : f32 to vector<8x32xf32>
    %418 = arith.addf %417, %416 : vector<8x32xf32>
    %419 = arith.divf %417, %418 : vector<8x32xf32>
    %420 = arith.mulf %411, %354 : vector<8x32xf32>
    %421 = arith.mulf %405, %413 : vector<8x32xf32>
    %422 = arith.addf %420, %421 : vector<8x32xf32>
    %423 = math.tanh %422 : vector<8x32xf32>
    %424 = arith.mulf %419, %423 : vector<8x32xf32>
    %c6_i32 = arith.constant 6 : i32
    %425 = arith.truncf %424 : vector<8x32xf32> to vector<8x32xbf16>
    %c0_130 = arith.constant 0 : index
    %c0_131 = arith.constant 0 : index
    %426 = vector.load %arg7[%c0_130, %c0_131] : memref<32x128xbf16, #tpu.memory_space<vmem>>, vector<32x128xbf16>
    %cst_132 = arith.constant dense<0.000000e+00> : vector<8x128xf32>
    %427 = tpu.matmul %425, %426, %cst_132 {dimension_numbers = #tpu.dot_dimension_numbers<[1], [0], [0], [1], [0, 0, 1, 1], [], []>} : vector<8x32xbf16>, vector<32x128xbf16>, vector<8x128xf32> -> vector<8x128xf32>
    %c8_i32_133 = arith.constant 8 : i32
    %428 = arith.muli %c6_i32, %c8_i32_133 : i32
    %429 = tpu.assume_multiple %428, 8 : i32
    %430 = arith.index_cast %429 : i32 to index
    %c0_134 = arith.constant 0 : index
    %431 = vector.load %arg10[%430, %c0_134] : memref<64x256xf32, #tpu.memory_space<vmem>>, vector<8x256xf32>
    %432 = arith.truncf %392 : vector<8x64xf32> to vector<8x64xbf16>
    %c0_135 = arith.constant 0 : index
    %c0_136 = arith.constant 0 : index
    %433 = vector.load %arg5[%c0_135, %c0_136] : memref<64x256xbf16, #tpu.memory_space<vmem>>, vector<64x256xbf16>
    %cst_137 = arith.constant dense<0.000000e+00> : vector<8x256xf32>
    %434 = tpu.matmul %432, %433, %cst_137 {dimension_numbers = #tpu.dot_dimension_numbers<[1], [0], [0], [1], [0, 0, 1, 1], [], []>} : vector<8x64xbf16>, vector<64x256xbf16>, vector<8x256xf32> -> vector<8x256xf32>
    %435 = arith.addf %431, %434 : vector<8x256xf32>
    %436 = vector.extract_strided_slice %435 {offsets = [0, 0], sizes = [8, 64], strides = [1, 1]} : vector<8x256xf32> to vector<8x64xf32>
    %437 = arith.negf %436 : vector<8x64xf32>
    %438 = math.exp %437 : vector<8x64xf32>
    %cst_138 = arith.constant 1.000000e+00 : f32
    %439 = vector.broadcast %cst_138 : f32 to vector<8x64xf32>
    %440 = arith.addf %439, %438 : vector<8x64xf32>
    %441 = arith.divf %439, %440 : vector<8x64xf32>
    %442 = vector.extract_strided_slice %435 {offsets = [0, 64], sizes = [8, 64], strides = [1, 1]} : vector<8x256xf32> to vector<8x64xf32>
    %443 = arith.negf %442 : vector<8x64xf32>
    %444 = math.exp %443 : vector<8x64xf32>
    %cst_139 = arith.constant 1.000000e+00 : f32
    %445 = vector.broadcast %cst_139 : f32 to vector<8x64xf32>
    %446 = arith.addf %445, %444 : vector<8x64xf32>
    %447 = arith.divf %445, %446 : vector<8x64xf32>
    %448 = vector.extract_strided_slice %435 {offsets = [0, 128], sizes = [8, 64], strides = [1, 1]} : vector<8x256xf32> to vector<8x64xf32>
    %449 = math.tanh %448 : vector<8x64xf32>
    %450 = vector.extract_strided_slice %435 {offsets = [0, 192], sizes = [8, 64], strides = [1, 1]} : vector<8x256xf32> to vector<8x64xf32>
    %451 = arith.negf %450 : vector<8x64xf32>
    %452 = math.exp %451 : vector<8x64xf32>
    %cst_140 = arith.constant 1.000000e+00 : f32
    %453 = vector.broadcast %cst_140 : f32 to vector<8x64xf32>
    %454 = arith.addf %453, %452 : vector<8x64xf32>
    %455 = arith.divf %453, %454 : vector<8x64xf32>
    %456 = arith.mulf %447, %390 : vector<8x64xf32>
    %457 = arith.mulf %441, %449 : vector<8x64xf32>
    %458 = arith.addf %456, %457 : vector<8x64xf32>
    %459 = math.tanh %458 : vector<8x64xf32>
    %460 = arith.mulf %455, %459 : vector<8x64xf32>
    %461 = arith.truncf %460 : vector<8x64xf32> to vector<8x64xbf16>
    %c0_141 = arith.constant 0 : index
    %c0_142 = arith.constant 0 : index
    %462 = vector.load %arg6[%c0_141, %c0_142] : memref<64x128xbf16, #tpu.memory_space<vmem>>, vector<64x128xbf16>
    %cst_143 = arith.constant dense<0.000000e+00> : vector<8x128xf32>
    %463 = tpu.matmul %461, %462, %cst_143 {dimension_numbers = #tpu.dot_dimension_numbers<[1], [0], [0], [1], [0, 0, 1, 1], [], []>} : vector<8x64xbf16>, vector<64x128xbf16>, vector<8x128xf32> -> vector<8x128xf32>
    %464 = arith.addf %427, %463 : vector<8x128xf32>
    %c0_144 = arith.constant 0 : index
    %c0_145 = arith.constant 0 : index
    %465 = vector.load %arg8[%c0_144, %c0_145] : memref<1x128xf32, #tpu.memory_space<vmem>>, vector<1x128xf32>
    %466 = vector.broadcast %465 : vector<1x128xf32> to vector<8x128xf32>
    %467 = arith.addf %464, %466 : vector<8x128xf32>
    %468 = vector.extract_strided_slice %467 {offsets = [0, 0], sizes = [8, 32], strides = [1, 1]} : vector<8x128xf32> to vector<8x32xf32>
    %469 = arith.negf %468 : vector<8x32xf32>
    %470 = math.exp %469 : vector<8x32xf32>
    %cst_146 = arith.constant 1.000000e+00 : f32
    %471 = vector.broadcast %cst_146 : f32 to vector<8x32xf32>
    %472 = arith.addf %471, %470 : vector<8x32xf32>
    %473 = arith.divf %471, %472 : vector<8x32xf32>
    %474 = vector.extract_strided_slice %467 {offsets = [0, 32], sizes = [8, 32], strides = [1, 1]} : vector<8x128xf32> to vector<8x32xf32>
    %475 = arith.negf %474 : vector<8x32xf32>
    %476 = math.exp %475 : vector<8x32xf32>
    %cst_147 = arith.constant 1.000000e+00 : f32
    %477 = vector.broadcast %cst_147 : f32 to vector<8x32xf32>
    %478 = arith.addf %477, %476 : vector<8x32xf32>
    %479 = arith.divf %477, %478 : vector<8x32xf32>
    %480 = vector.extract_strided_slice %467 {offsets = [0, 64], sizes = [8, 32], strides = [1, 1]} : vector<8x128xf32> to vector<8x32xf32>
    %481 = math.tanh %480 : vector<8x32xf32>
    %482 = vector.extract_strided_slice %467 {offsets = [0, 96], sizes = [8, 32], strides = [1, 1]} : vector<8x128xf32> to vector<8x32xf32>
    %483 = arith.negf %482 : vector<8x32xf32>
    %484 = math.exp %483 : vector<8x32xf32>
    %cst_148 = arith.constant 1.000000e+00 : f32
    %485 = vector.broadcast %cst_148 : f32 to vector<8x32xf32>
    %486 = arith.addf %485, %484 : vector<8x32xf32>
    %487 = arith.divf %485, %486 : vector<8x32xf32>
    %488 = arith.mulf %479, %422 : vector<8x32xf32>
    %489 = arith.mulf %473, %481 : vector<8x32xf32>
    %490 = arith.addf %488, %489 : vector<8x32xf32>
    %491 = math.tanh %490 : vector<8x32xf32>
    %492 = arith.mulf %487, %491 : vector<8x32xf32>
    %c7_i32 = arith.constant 7 : i32
    %493 = arith.truncf %492 : vector<8x32xf32> to vector<8x32xbf16>
    %c0_149 = arith.constant 0 : index
    %c0_150 = arith.constant 0 : index
    %494 = vector.load %arg7[%c0_149, %c0_150] : memref<32x128xbf16, #tpu.memory_space<vmem>>, vector<32x128xbf16>
    %cst_151 = arith.constant dense<0.000000e+00> : vector<8x128xf32>
    %495 = tpu.matmul %493, %494, %cst_151 {dimension_numbers = #tpu.dot_dimension_numbers<[1], [0], [0], [1], [0, 0, 1, 1], [], []>} : vector<8x32xbf16>, vector<32x128xbf16>, vector<8x128xf32> -> vector<8x128xf32>
    %c8_i32_152 = arith.constant 8 : i32
    %496 = arith.muli %c7_i32, %c8_i32_152 : i32
    %497 = tpu.assume_multiple %496, 8 : i32
    %498 = arith.index_cast %497 : i32 to index
    %c0_153 = arith.constant 0 : index
    %499 = vector.load %arg10[%498, %c0_153] : memref<64x256xf32, #tpu.memory_space<vmem>>, vector<8x256xf32>
    %500 = arith.truncf %460 : vector<8x64xf32> to vector<8x64xbf16>
    %c0_154 = arith.constant 0 : index
    %c0_155 = arith.constant 0 : index
    %501 = vector.load %arg5[%c0_154, %c0_155] : memref<64x256xbf16, #tpu.memory_space<vmem>>, vector<64x256xbf16>
    %cst_156 = arith.constant dense<0.000000e+00> : vector<8x256xf32>
    %502 = tpu.matmul %500, %501, %cst_156 {dimension_numbers = #tpu.dot_dimension_numbers<[1], [0], [0], [1], [0, 0, 1, 1], [], []>} : vector<8x64xbf16>, vector<64x256xbf16>, vector<8x256xf32> -> vector<8x256xf32>
    %503 = arith.addf %499, %502 : vector<8x256xf32>
    %504 = vector.extract_strided_slice %503 {offsets = [0, 0], sizes = [8, 64], strides = [1, 1]} : vector<8x256xf32> to vector<8x64xf32>
    %505 = arith.negf %504 : vector<8x64xf32>
    %506 = math.exp %505 : vector<8x64xf32>
    %cst_157 = arith.constant 1.000000e+00 : f32
    %507 = vector.broadcast %cst_157 : f32 to vector<8x64xf32>
    %508 = arith.addf %507, %506 : vector<8x64xf32>
    %509 = arith.divf %507, %508 : vector<8x64xf32>
    %510 = vector.extract_strided_slice %503 {offsets = [0, 64], sizes = [8, 64], strides = [1, 1]} : vector<8x256xf32> to vector<8x64xf32>
    %511 = arith.negf %510 : vector<8x64xf32>
    %512 = math.exp %511 : vector<8x64xf32>
    %cst_158 = arith.constant 1.000000e+00 : f32
    %513 = vector.broadcast %cst_158 : f32 to vector<8x64xf32>
    %514 = arith.addf %513, %512 : vector<8x64xf32>
    %515 = arith.divf %513, %514 : vector<8x64xf32>
    %516 = vector.extract_strided_slice %503 {offsets = [0, 128], sizes = [8, 64], strides = [1, 1]} : vector<8x256xf32> to vector<8x64xf32>
    %517 = math.tanh %516 : vector<8x64xf32>
    %518 = vector.extract_strided_slice %503 {offsets = [0, 192], sizes = [8, 64], strides = [1, 1]} : vector<8x256xf32> to vector<8x64xf32>
    %519 = arith.negf %518 : vector<8x64xf32>
    %520 = math.exp %519 : vector<8x64xf32>
    %cst_159 = arith.constant 1.000000e+00 : f32
    %521 = vector.broadcast %cst_159 : f32 to vector<8x64xf32>
    %522 = arith.addf %521, %520 : vector<8x64xf32>
    %523 = arith.divf %521, %522 : vector<8x64xf32>
    %524 = arith.mulf %515, %458 : vector<8x64xf32>
    %525 = arith.mulf %509, %517 : vector<8x64xf32>
    %526 = arith.addf %524, %525 : vector<8x64xf32>
    %527 = math.tanh %526 : vector<8x64xf32>
    %528 = arith.mulf %523, %527 : vector<8x64xf32>
    %529 = arith.truncf %528 : vector<8x64xf32> to vector<8x64xbf16>
    %c0_160 = arith.constant 0 : index
    %c0_161 = arith.constant 0 : index
    %530 = vector.load %arg6[%c0_160, %c0_161] : memref<64x128xbf16, #tpu.memory_space<vmem>>, vector<64x128xbf16>
    %cst_162 = arith.constant dense<0.000000e+00> : vector<8x128xf32>
    %531 = tpu.matmul %529, %530, %cst_162 {dimension_numbers = #tpu.dot_dimension_numbers<[1], [0], [0], [1], [0, 0, 1, 1], [], []>} : vector<8x64xbf16>, vector<64x128xbf16>, vector<8x128xf32> -> vector<8x128xf32>
    %532 = arith.addf %495, %531 : vector<8x128xf32>
    %c0_163 = arith.constant 0 : index
    %c0_164 = arith.constant 0 : index
    %533 = vector.load %arg8[%c0_163, %c0_164] : memref<1x128xf32, #tpu.memory_space<vmem>>, vector<1x128xf32>
    %534 = vector.broadcast %533 : vector<1x128xf32> to vector<8x128xf32>
    %535 = arith.addf %532, %534 : vector<8x128xf32>
    %536 = vector.extract_strided_slice %535 {offsets = [0, 0], sizes = [8, 32], strides = [1, 1]} : vector<8x128xf32> to vector<8x32xf32>
    %537 = arith.negf %536 : vector<8x32xf32>
    %538 = math.exp %537 : vector<8x32xf32>
    %cst_165 = arith.constant 1.000000e+00 : f32
    %539 = vector.broadcast %cst_165 : f32 to vector<8x32xf32>
    %540 = arith.addf %539, %538 : vector<8x32xf32>
    %541 = arith.divf %539, %540 : vector<8x32xf32>
    %542 = vector.extract_strided_slice %535 {offsets = [0, 32], sizes = [8, 32], strides = [1, 1]} : vector<8x128xf32> to vector<8x32xf32>
    %543 = arith.negf %542 : vector<8x32xf32>
    %544 = math.exp %543 : vector<8x32xf32>
    %cst_166 = arith.constant 1.000000e+00 : f32
    %545 = vector.broadcast %cst_166 : f32 to vector<8x32xf32>
    %546 = arith.addf %545, %544 : vector<8x32xf32>
    %547 = arith.divf %545, %546 : vector<8x32xf32>
    %548 = vector.extract_strided_slice %535 {offsets = [0, 64], sizes = [8, 32], strides = [1, 1]} : vector<8x128xf32> to vector<8x32xf32>
    %549 = math.tanh %548 : vector<8x32xf32>
    %550 = vector.extract_strided_slice %535 {offsets = [0, 96], sizes = [8, 32], strides = [1, 1]} : vector<8x128xf32> to vector<8x32xf32>
    %551 = arith.negf %550 : vector<8x32xf32>
    %552 = math.exp %551 : vector<8x32xf32>
    %cst_167 = arith.constant 1.000000e+00 : f32
    %553 = vector.broadcast %cst_167 : f32 to vector<8x32xf32>
    %554 = arith.addf %553, %552 : vector<8x32xf32>
    %555 = arith.divf %553, %554 : vector<8x32xf32>
    %556 = arith.mulf %547, %490 : vector<8x32xf32>
    %557 = arith.mulf %541, %549 : vector<8x32xf32>
    %558 = arith.addf %556, %557 : vector<8x32xf32>
    %559 = math.tanh %558 : vector<8x32xf32>
    %560 = arith.mulf %555, %559 : vector<8x32xf32>
    %c8_i32_168 = arith.constant 8 : i32
    %c0_169 = arith.constant 0 : index
    %c0_170 = arith.constant 0 : index
    %561 = vector.load %arg11[%c0_169, %c0_170] : memref<8x64xf32, #tpu.memory_space<vmem>>, vector<8x64xf32>
    tpu.vector_store %arg11[%c0_169, %c0_170], %528 {strides = array<i32>} : memref<8x64xf32, #tpu.memory_space<vmem>>, vector<8x64xf32>,
    %c0_171 = arith.constant 0 : index
    %c0_172 = arith.constant 0 : index
    %562 = vector.load %arg12[%c0_171, %c0_172] : memref<8x64xf32, #tpu.memory_space<vmem>>, vector<8x64xf32>
    tpu.vector_store %arg12[%c0_171, %c0_172], %526 {strides = array<i32>} : memref<8x64xf32, #tpu.memory_space<vmem>>, vector<8x64xf32>,
    %c0_173 = arith.constant 0 : index
    %c0_174 = arith.constant 0 : index
    %563 = vector.load %arg13[%c0_173, %c0_174] : memref<8x32xf32, #tpu.memory_space<vmem>>, vector<8x32xf32>
    tpu.vector_store %arg13[%c0_173, %c0_174], %560 {strides = array<i32>} : memref<8x32xf32, #tpu.memory_space<vmem>>, vector<8x32xf32>,
    %c0_175 = arith.constant 0 : index
    %c0_176 = arith.constant 0 : index
    %564 = vector.load %arg14[%c0_175, %c0_176] : memref<8x32xf32, #tpu.memory_space<vmem>>, vector<8x32xf32>
    tpu.vector_store %arg14[%c0_175, %c0_176], %558 {strides = array<i32>} : memref<8x32xf32, #tpu.memory_space<vmem>>, vector<8x32xf32>,
    %c0_i32_177 = arith.constant 0 : i32
    %565 = arith.cmpi eq, %arg1, %c0_i32_177 : i32
    %566 = arith.extui %565 : i1 to i32
    %c0_i32_178 = arith.constant 0 : i32
    %567 = arith.cmpi ne, %566, %c0_i32_178 : i32
    scf.if %567 {
      %c0_179 = arith.constant 0 : index
      %c0_180 = arith.constant 0 : index
      %c0_181 = arith.constant 0 : index
      %568 = vector.load %arg9[%c0_179, %c0_180, %c0_181] : memref<1x8x32xf32, #tpu.memory_space<vmem>>, vector<1x8x32xf32>
      %569 = vector.shape_cast %568 : vector<1x8x32xf32> to vector<8x32xf32>
      %570 = vector.shape_cast %560 : vector<8x32xf32> to vector<1x8x32xf32>
      tpu.vector_store %arg9[%c0_179, %c0_180, %c0_181], %570 {strides = array<i32>} : memref<1x8x32xf32, #tpu.memory_space<vmem>>, vector<1x8x32xf32>,
    } else {
    }
    return
  }
  func.func @transform_0(%arg0: i32, %arg1: i32) -> (i32, i32, i32) {
    %c0_i32 = arith.constant 0 : i32
    %c0_i32_0 = arith.constant 0 : i32
    return %arg0, %arg1, %c0_i32 : i32, i32, i32
  }
  func.func @transform_1(%arg0: i32, %arg1: i32) -> (i32, i32) {
    %c0_i32 = arith.constant 0 : i32
    %c0_i32_0 = arith.constant 0 : i32
    %c0_i32_1 = arith.constant 0 : i32
    return %c0_i32, %c0_i32_0 : i32, i32
  }
  func.func @transform_2(%arg0: i32, %arg1: i32) -> (i32, i32) {
    %c0_i32 = arith.constant 0 : i32
    %c0_i32_0 = arith.constant 0 : i32
    %c0_i32_1 = arith.constant 0 : i32
    return %c0_i32, %c0_i32_0 : i32, i32
  }
  func.func @transform_3(%arg0: i32, %arg1: i32) -> (i32, i32) {
    %c0_i32 = arith.constant 0 : i32
    %c0_i32_0 = arith.constant 0 : i32
    %c0_i32_1 = arith.constant 0 : i32
    return %c0_i32, %c0_i32_0 : i32, i32
  }
  func.func @transform_4(%arg0: i32, %arg1: i32) -> (i32, i32) {
    %c0_i32 = arith.constant 0 : i32
    %c0_i32_0 = arith.constant 0 : i32
    %c0_i32_1 = arith.constant 0 : i32
    return %c0_i32, %c0_i32_0 : i32, i32
  }
  func.func @transform_5(%arg0: i32, %arg1: i32) -> (i32, i32) {
    %c0_i32 = arith.constant 0 : i32
    %c0_i32_0 = arith.constant 0 : i32
    %c0_i32_1 = arith.constant 0 : i32
    return %c0_i32, %c0_i32_0 : i32, i32
  }
  func.func @transform_6(%arg0: i32, %arg1: i32) -> (i32, i32) {
    %c0_i32 = arith.constant 0 : i32
    %c0_i32_0 = arith.constant 0 : i32
    %c0_i32_1 = arith.constant 0 : i32
    return %c0_i32, %c0_i32_0 : i32, i32
  }
  func.func @transform_7(%arg0: i32, %arg1: i32) -> (i32, i32, i32) {
    %c0_i32 = arith.constant 0 : i32
    %c0_i32_0 = arith.constant 0 : i32
    %c0_i32_1 = arith.constant 0 : i32
    return %arg0, %c0_i32, %c0_i32_0 : i32, i32, i32
  }
}

</mosaic_0001>

<bundles_post_ra>
// kernel: tpu_custom_call.1
= control target key start
LH: loop header
LB: loop body
LE: loop exit
PB: predicated region body
PF: predicated region fallthrough
CT: control target
= control target key end

     0   :  { %12 = vsyncpa [#allocation8], 0  ;;  %s3105_s0 = inlined_call_operand.vmem [shape: f32[1,64,1], index: 0, kind: input, shape index: {}]   ;;  %s3106_s1 = inlined_call_operand.hbm [shape: f32[1,256], index: 1, kind: input, shape index: {}]   ;;  %s3107_s2 = inlined_call_operand.hbm [shape: f32[1,256], index: 2, kind: input, shape index: {}]   ;;  %s3108_s3 = inlined_call_operand.vmem [shape: bf16[64,256], index: 3, kind: input, shape index: {}]   ;;  %s3109_s4 = inlined_call_operand.hbm [shape: bf16[64,128], index: 4, kind: input, shape index: {}]   ;;  %s3110_s5 = inlined_call_operand.vmem [shape: bf16[32,128], index: 5, kind: input, shape index: {}]   ;;  %s3111_s6 = inlined_call_operand.vmem [shape: f32[1,128], index: 6, kind: input, shape index: {}]   ;;  %s3112_s7 = inlined_call_operand.hbm [shape: f32[1,8,32], index: 7, kind: output, shape index: {}]  }
   0x1   :  { %13 = vsyncpa [#allocation11], 0 }
   0x2   :  { %14 = vsyncpa [#allocation9], 0  ;;  %s2459_s24 = smov [#allocation10]   ;;  %s2460_s26 = smov [#allocation7]  }
   0x3   :  { %s33_s25 = sshll.u32 %s2459_s24, 4  ;;  %s23_s27 = sshll.u32 %s2460_s26, 4  ;;  %s34_s25 = int_to_ptr.vmem [resolvable:$true] %s33_s25  ;;  %s24_s27 = int_to_ptr.vmem [resolvable:$true] %s23_s27 }
   0x4   :  { %s2365_s30 = scalar_lea.hbm %s3107_s2, 32 }
   0x5   :  { %p2366_p0 = scmp.ne.s32.totalorder %s3107_s2, %s2365_s30  ;;  %p2369_p1 = scmp.lt.u32.totalorder %s2365_s30, %s3107_s2 }
   0x7   :  { %p2371_p2 = pnand %p2369_p1, %p2366_p0 }
   0x9   :  { %2374 = shalt.err (!%p2371_p2)
}
   0xa   :  { %s2375_s12 = scalar_lea.vmem %s34_s25, 32  ;;  %p2380_p4 = scmp.lt.s32.totalorder %s34_s25, %s34_s25 }
   0xb   :  { %p2376_p3 = scmp.ne.s32.totalorder %s34_s25, %s2375_s12  ;;  %p2381_p5 = scmp.lt.s32.totalorder %s2375_s12, %s2375_s12 }
   0xd   :  { %p2382_p6 = por %p2381_p5, %p2380_p4 }
   0xf   :  { %p2383_p7 = pnand %p2382_p6, %p2376_p3 }
  0x11   :  { %2386 = shalt.err (!%p2383_p7)
}
  0x12   :  { %36 = dma.hbm_to_vmem [thread:$0]  %s3107_s2, 32, %s34_s25, [#allocation11]  }
  0x13   :  { %s2387_s17 = scalar_lea.hbm %s3106_s1, 32 }
  0x14   :  { %p2388_p8 = scmp.ne.s32.totalorder %s3106_s1, %s2387_s17  ;;  %p2391_p9 = scmp.lt.u32.totalorder %s2387_s17, %s3106_s1 }
  0x16   :  { %p2393_p10 = pnand %p2391_p9, %p2388_p8 }
  0x18   :  { %2396 = shalt.err (!%p2393_p10)
}
  0x19   :  { %s2397_s22 = scalar_lea.vmem %s24_s27, 32  ;;  %p2402_p12 = scmp.lt.s32.totalorder %s24_s27, %s24_s27 }
  0x1a   :  { %p2398_p11 = scmp.ne.s32.totalorder %s24_s27, %s2397_s22  ;;  %p2403_p13 = scmp.lt.s32.totalorder %s2397_s22, %s2397_s22 }
  0x1c   :  { %p2404_p0 = por %p2403_p13, %p2402_p12 }
  0x1e   :  { %p2405_p1 = pnand %p2404_p0, %p2398_p11 }
  0x20   :  { %2408 = shalt.err (!%p2405_p1)
}
  0x21   :  { %26 = dma.hbm_to_vmem [thread:$0]  %s3106_s1, 32, %s24_s27, [#allocation8]  }
  0x22   :  { %s2461_s24 = smov [#allocation12]   ;;  %s2409_s29 = scalar_lea.hbm %s3109_s4, 512 }
  0x23   :  { %s44_s25 = sshll.u32 %s2461_s24, 4  ;;  %p2410_p2 = scmp.ne.s32.totalorder %s3109_s4, %s2409_s29  ;;  %s45_s25 = int_to_ptr.vmem [resolvable:$true] %s44_s25 }
  0x24   :  { %p2413_p3 = scmp.lt.u32.totalorder %s2409_s29, %s3109_s4 }
  0x26   :  { %p2415_p4 = pnand %p2413_p3, %p2410_p2 }
  0x28   :  { %2418 = shalt.err (!%p2415_p4)
}
  0x29   :  { %s2419_s11 = scalar_lea.vmem %s45_s25, 512  ;;  %p2424_p6 = scmp.lt.s32.totalorder %s45_s25, %s45_s25 }
  0x2a   :  { %p2420_p5 = scmp.ne.s32.totalorder %s45_s25, %s2419_s11  ;;  %p2425_p7 = scmp.lt.s32.totalorder %s2419_s11, %s2419_s11 }
  0x2c   :  { %p2426_p8 = por %p2425_p7, %p2424_p6 }
  0x2e   :  { %p2427_p9 = pnand %p2426_p8, %p2420_p5 }
  0x30   :  { %2430 = shalt.err (!%p2427_p9)
}
  0x31   :  { %s2462_s1 = smov 64   ;;  %s2463_s27 = smov 4  }
  0x32   :  { %50 = dma.hbm_to_vmem [thread:$0]  %s3109_s4, 512, %s45_s25, [#allocation11], %s2462_s1, %s2462_s1, %s2463_s27  }
  0x33   :  { %2453 = dma.done.wait [#allocation8], 32  }
  0x34   :  { %2454 = vsyncadd [#allocation8], 4294967264 }
  0x35   :  { %2455 = dma.done.wait [#allocation11], 544  }
  0x36   :  { %2456 = vsyncadd [#allocation11], 4294966752  ;;  %vm69_vm0 = vcmask 523264   ;;  %v2464_v0 = vmov 0   ;;  %v2465_v1 = vmov 0.0   ;;  %v75_v7 = vld [vmem:[%s3105_s0] sm:$0xff]  ;;  %v125_v14 = vlaneseq }
  0x37   :  { %294 = vmatprep.mubr.bf16.mxu0 %v2464_v0  ;;  %70 = vst.msk [vmem:[#allocation3] sm:$0xff] %vm69_vm0, %v2465_v1  ;;  %71 = vst.msk [vmem:[#allocation4] sm:$0xff] %vm69_vm0, %v2465_v1  ;;  %2170 = vset.pattern.permute.xlu0 %v2464_v0  ;;  %v2559_v2 = vld [vmem:[%s3108_s3 + $0x4] ss:$8 sps:$4 sm:$0xff]   ;;  %v2564_v3 = vld [vmem:[%s3108_s3] ss:$8 sps:$4 sm:$0xff]  }
  0x38   :  { %1999 = vmatprep.subr.bf16.mxu1 %v2465_v1  ;;  %2171 = vset.pattern.permute.xlu1 %v2464_v0  ;;  %v2570_v4 = vld [vmem:[%s3108_s3 + $0x14] ss:$8 sps:$4 sm:$0xff]   ;;  %v2576_v5 = vld [vmem:[%s3108_s3 + $0x10] ss:$8 sps:$4 sm:$0xff]   ;;  %v2582_v6 = vld [vmem:[%s3108_s3 + $0x24] ss:$8 sps:$4 sm:$0xff]  }
  0x39   :  { %262 = vmatprep.subr.bf16.mxu0 %v2559_v2  ;;  %v2590_v8 = vld [vmem:[%s3108_s3 + $0x20] ss:$8 sps:$4 sm:$0xff]   ;;  %v2595_v9 = vld [vmem:[%s3108_s3 + $0x34] ss:$8 sps:$4 sm:$0xff]   ;;  %86 = vperm.xlu0 %2170, %v75_v7   ;;  %v2604_v11 = vld [vmem:[%s3108_s3 + $0x30] ss:$8 sps:$4 sm:$0xff]  }
  0x3a   :  { %263 = vmatpush1.bf16.msra.mxu0 %v2564_v3  ;;  %v126_v15 = vshrl.u32 %v125_v14, 7  ;;  %v83_v17 = vld [vmem:[#allocation7] sm:$0x3]  ;;  %v151_v20 = vld [vmem:[#allocation10] sm:$0x3]  ;;  %v2623_v41 = vld [vmem:[#allocation12] sm:$0xff]  }
  0x3b   :  { %264 = vmatprep.subr.bf16.mxu0 %v2570_v4  ;;  %v2628_v42 = vld [vmem:[%s3110_s5] sm:$0xff]   ;;  %vm72_vm1 = vcmask 261120   ;;  %vm2466_vm2 = vmmov 0   ;;  %2000 = vmatpush3.bf16.msra.mxu1 %v2623_v41  ;;  %v2645_v44 = vld [vmem:[%s3110_s5 + $0x8] sm:$0xff]   ;;  %s2467_s14 = smov 32   ;;  %s2469_s22 = smov [#allocation13]  }
  0x3c   :  { %v127_v16 = vsub.s32 0, %v126_v15  ;;  %v131_v23 = vsub.s32 1, %v126_v15  ;;  %73 = vst.msk [vmem:[#allocation5] sm:$0xff] %vm72_vm1, %v2465_v1  ;;  %74 = vst.msk [vmem:[#allocation6] sm:$0xff] %vm72_vm1, %v2465_v1  ;;  %2007 = vmatprep.mubr.msk.bf16.mxu1 %vm2466_vm2, %v2465_v1  ;;  %v2639_v43 = vld [vmem:[#allocation12 + $0x8] sm:$0xff]   ;;  %2001 = vmatprep.subr.bf16.mxu1 %v2465_v1  ;;  %v2650_v45 = vld [vmem:[#allocation12 + $0x10] sm:$0xff]  }
  0x3d   :  { %v2656_v48 = vld [vmem:[#allocation12 + $0x18] sm:$0xff]   ;;  %s1855_s2 = sshll.u32 %s2469_s22, 4  ;;  %s1856_s2 = int_to_ptr.vmem [resolvable:$true] %s1855_s2 }
  0x3e   :  { %v196_v10 = vld [vmem:[#allocation4] sm:$0xff]  ;;  %265 = vmatpush1.bf16.msra.mxu0 %v2576_v5  ;;  %v195_v12 = vld [vmem:[#allocation3] sm:$0xff]  ;;  %v2610_v18 = vrot.slane %v83_v17, %v127_v16  ;;  %v2613_v22 = vrot.slane %v151_v20, %v127_v16  ;;  %v2616_v26 = vrot.slane %v83_v17, %v131_v23  ;;  %v2619_v33 = vrot.slane %v151_v20, %v131_v23  ;;  %v76_v60 = vld [vmem:[%s3105_s0 + $0x8] sm:$0xff]  ;;  %s2431_s23 = scalar_lea.vmem %s1856_s2, 128  ;;  %p2436_p11 = scmp.lt.s32.totalorder %s1856_s2, %s1856_s2 }
  0x3f   :  { %266 = vmatprep.subr.bf16.mxu0 %v2582_v6  ;;  %319 = vrot.lane.b32.xlu0 %v196_v10, %s2462_s1  ;;  %v209_v13 = vpack.c.bf16 %v195_v12, %v195_v12  ;;  %p2432_p10 = scmp.ne.s32.totalorder %s1856_s2, %s2431_s23  ;;  %p2437_p12 = scmp.lt.s32.totalorder %s2431_s23, %s2431_s23 }
  0x40   :  { %2002 = vmatpush3.bf16.msra.mxu1 %v2639_v43 }
  0x41   :  { %2003 = vmatprep.subr.bf16.mxu1 %v2465_v1  ;;  %p2438_p13 = por %p2437_p12, %p2436_p11 }
  0x42   :  { %267 = vmatpush1.bf16.msra.mxu0 %v2590_v8 }
  0x43   :  { %268 = vmatprep.subr.bf16.mxu0 %v2595_v9  ;;  %v197_v46 = vld [vmem:[#allocation5] sm:$0xff]  ;;  %p2439_p0 = pnand %p2438_p13, %p2432_p10 }
  0x44   :  { %v199_v47 = vpack.c.bf16 %v197_v46, %v197_v46  ;;  %2004 = vmatpush3.bf16.msra.mxu1 %v2650_v45 }
  0x45   :  { %2005 = vmatprep.subr.bf16.mxu1 %v2465_v1 }
  0x46   :  { %269 = vmatpush1.bf16.msra.mxu0 %v2604_v11 }
  0x47   :  { %2011 = vmatprep.subr.bf16.mxu0 %v2465_v1 }
  0x48   :  { %2006 = vmatpush3.bf16.msra.mxu1 %v2656_v48 }
  0x49   :  { %1880 = vmatmul.mubr.msk.bf16.vlgmr.msra.gmra.mrb[0].mxu0 %vm69_vm0, %v209_v13  ;;  %508 = vmatprep.subr.bf16.mxu1 %v2559_v2  ;;  %v2699_v13 = vld [vmem:[%s3111_s6] ss:$0 sm:$0xff] }
  0x4a   :  { %2015 = vmatprep.mubr.msk.bf16.mxu0 %vm2466_vm2, %v2465_v1  ;;  %2012 = vmatpush3.bf16.msra.mxu0 %v2628_v42 }
  0x4b   :  { %2013 = vmatprep.subr.bf16.mxu0 %v2465_v1 }
  0x4e   :  { %2014 = vmatpush3.bf16.msra.mxu0 %v2645_v44 }
  0x4f   :  { %2019 = vmatprep.subr.bf16.mxu0 %v2465_v1 }
  0x51   :  { %2016 = vmatmul.mubr.msk.bf16.vlgmr.msra.gmra.mrb[4].mxu0 %vm72_vm1, %v199_v47 }
  0x52   :  { %2020 = vmatpush3.bf16.msra.mxu0 %v2623_v41  ;;  %2027 = vmatprep.mubr.msk.bf16.mxu0 %vm2466_vm2, %v2465_v1 }
  0x53   :  { %2021 = vmatprep.subr.bf16.mxu0 %v2465_v1 }
  0x56   :  { %2022 = vmatpush3.bf16.msra.mxu0 %v2639_v43 }
  0x57   :  { %2023 = vmatprep.subr.bf16.mxu0 %v2465_v1 }
  0x5a   :  { %2024 = vmatpush3.bf16.msra.mxu0 %v2650_v45 }
  0x5b   :  { %2025 = vmatprep.subr.bf16.mxu0 %v2465_v1 }
  0x5e   :  { %2026 = vmatpush3.bf16.msra.mxu0 %v2656_v48 }
  0x5f   :  { %697 = vmatprep.subr.bf16.mxu0 %v2559_v2 }
  0xb8   :  { %v87_v19 = vpop.permute.xlu0 %86 }
  0xb9   :  { %v135_v21 = vmul.f32 %v2610_v18, %v87_v19  ;;  %v136_v32 = vmul.f32 %v2616_v26, %v87_v19 }
  0xbb   :  { %v163_v24 = vadd.f32 %v2613_v22, %v135_v21  ;;  %v164_v34 = vadd.f32 %v2619_v33, %v136_v32 }
  0xbc   :  { %v320_v51 = vpop.permute.xlu0 %319 }
 0x11c   :  { %v296_v25 = vpop.f32.mrb[0].mxu0 }
 0x11d   :  { %v303_v27 = vadd.f32 %v296_v25, %v163_v24  ;;  %v298_v28 = vpop.f32.mrb[1].mxu0 }
 0x11e   :  { %v300_v29 = vpop.f32.mrb[2].mxu0  ;;  %v304_v35 = vadd.f32 %v298_v28, %v164_v34 }
 0x11f   :  { %v1881_v30 = vmul.f32 -1.442695, %v303_v27  ;;  %v301_v31 = vpop.f32.mrb[3].mxu0  ;;  %v198_v29 = vld [vmem:[#allocation6] sm:$0xff] }
 0x120   :  { %v1882_v49 = vmul.f32 -1.442695, %v304_v35 }
 0x121   :  { %2190 = vpow2.f32 %v1881_v30 }
 0x122   :  { %2192 = vtanh.f32 %v304_v35 }
 0x124   :  { %v460_v61 = vpop.f32.mrb[4].mxu0 }
 0x125   :  { %v2017_v62 = vpop.f32.mrb[5].mxu0 }
 0x126   :  { %v463_v63 = vpop.f32.mrb[6].mxu0 }
 0x127   :  { %v2018_v7 = vpop.f32.mrb[7].mxu0 }
 0x12b   :  { %v2191_v36 = vpop.eup %2190 }
 0x12c   :  { %v308_v37 = vadd.f32 1.0, %v2191_v36  ;;  %v2193_v38 = vpop.eup %2192 }
 0x12e   :  { %2194 = vrcp.f32 %v308_v37 }
 0x12f   :  { %2196 = vpow2.f32 %v1882_v49 }
 0x138   :  { %v2195_v39 = vpop.eup %2194 }
 0x139   :  { %v323_v40 = vmul.f32 %v2195_v39, %v2193_v38  ;;  %v2197_v50 = vpop.eup %2196  ;;  %v322_v53 = vmul.f32 %v2195_v39, %v320_v51 }
 0x13a   :  { %v315_v52 = vadd.f32 1.0, %v2197_v50 }
 0x13b   :  { %325 = vrot.lane.b32.xlu1 %v323_v40, %s2462_s1 }
 0x13c   :  { %2198 = vrcp.f32 %v315_v52 }
 0x146   :  { %v2199_v56 = vpop.eup %2198 }
 0x1ad   :  { %v326_v54 = vpop.permute.xlu1 %325 }
 0x1ae   :  { %v2672_v55 = vadd.f32 %v326_v54, %v322_v53 }
 0x1b0   :  { %2200 = vtanh.f32 %v2672_v55 }
 0x1ba   :  { %v2201_v57 = vpop.eup %2200 }
 0x1bb   :  { %v330_v58 = vmul.f32 %v2201_v57, %v2199_v56 }
 0x1bd   :  { %v331_v59 = vpack.c.bf16 %v330_v58, %v330_v58 }
 0x1bf   :  { %341 = vrot.lane.b32.xlu1 %v331_v59, %s2462_s1 }
 0x1c3   :  { %91 = vperm.xlu1 %2171, %v76_v60  }
 0x231   :  { %v342_v10 = vpop.permute.xlu1 %341 }
 0x232   :  { %2008 = vmatmul.mubr.msk.bf16.vlgmr.msra.gmra.mrb[0].mxu1 %vm69_vm0, %v342_v10 }
 0x233   :  { %509 = vmatpush1.bf16.msra.mxu1 %v2564_v3  ;;  %540 = vmatprep.mubr.bf16.mxu1 %v2464_v0 }
 0x234   :  { %510 = vmatprep.subr.bf16.mxu1 %v2570_v4 }
 0x237   :  { %511 = vmatpush1.bf16.msra.mxu1 %v2576_v5 }
 0x238   :  { %512 = vmatprep.subr.bf16.mxu1 %v2582_v6 }
 0x23b   :  { %513 = vmatpush1.bf16.msra.mxu1 %v2590_v8 }
 0x23c   :  { %514 = vmatprep.subr.bf16.mxu1 %v2595_v9 }
 0x23f   :  { %515 = vmatpush1.bf16.msra.mxu1 %v2604_v11 }
 0x240   :  { %2031 = vmatprep.subr.bf16.mxu1 %v2465_v1 }
 0x242   :  { %1893 = vmatmul.mubr.msk.bf16.vlgmr.msra.gmra.mrb[4].mxu1 %vm69_vm0, %v342_v10  ;;  %v92_v20 = vpop.permute.xlu1 %91 }
 0x243   :  { %2032 = vmatpush3.bf16.msra.mxu1 %v2628_v42  ;;  %2035 = vmatprep.mubr.msk.bf16.mxu1 %vm2466_vm2, %v2465_v1  ;;  %v137_v21 = vmul.f32 %v2610_v18, %v92_v20  ;;  %v138_v34 = vmul.f32 %v2616_v26, %v92_v20 }
 0x244   :  { %2033 = vmatprep.subr.bf16.mxu1 %v2465_v1 }
 0x245   :  { %v165_v23 = vadd.f32 %v2613_v22, %v137_v21  ;;  %v166_v35 = vadd.f32 %v2619_v33, %v138_v34  ;;  %v77_v21 = vld [vmem:[%s3105_s0 + $0x10] sm:$0xff] }
 0x247   :  { %2034 = vmatpush3.bf16.msra.mxu1 %v2645_v44 }
 0x248   :  { %2039 = vmatprep.subr.bf16.mxu1 %v2465_v1 }
 0x305   :  { %v404_v12 = vpop.f32.mrb[0].mxu1 }
 0x306   :  { %v461_v14 = vadd.f32 %v460_v61, %v404_v12  ;;  %v2009_v15 = vpop.f32.mrb[1].mxu1 }
 0x307   :  { %v407_v16 = vpop.f32.mrb[2].mxu1 }
 0x308   :  { %v473_v17 = vadd.f32 %v2699_v13, %v461_v14  ;;  %v2010_v19 = vpop.f32.mrb[3].mxu1 }
 0x30a   :  { %2202 = vtanh.f32 %v473_v17  ;;  %v1892_v47 = vmul.f32 -1.442695, %v473_v17 }
 0x314   :  { %v2203_v24 = vpop.eup %2202 }
 0x315   :  { %v542_v25 = vpop.f32.mrb[4].mxu1  ;;  %487 = vrot.lane.b32.xlu0 %v2203_v24, %s2462_s1 }
 0x316   :  { %v549_v27 = vadd.f32 %v542_v25, %v165_v23  ;;  %v544_v28 = vpop.f32.mrb[5].mxu1 }
 0x317   :  { %v546_v30 = vpop.f32.mrb[6].mxu1  ;;  %v550_v36 = vadd.f32 %v544_v28, %v166_v35 }
 0x318   :  { %v1894_v31 = vmul.f32 -1.442695, %v549_v27  ;;  %v547_v32 = vpop.f32.mrb[7].mxu1 }
 0x319   :  { %482 = vrot.lane.b32.xlu0 %v198_v29, %s2467_s14  ;;  %v1895_v54 = vmul.f32 -1.442695, %v550_v36 }
 0x31a   :  { %2204 = vpow2.f32 %v1894_v31 }
 0x31b   :  { %2206 = vtanh.f32 %v550_v36 }
 0x324   :  { %v2205_v37 = vpop.eup %2204 }
 0x325   :  { %v554_v38 = vadd.f32 1.0, %v2205_v37  ;;  %v2207_v39 = vpop.eup %2206 }
 0x327   :  { %2208 = vrcp.f32 %v554_v38 }
 0x328   :  { %2210 = vpow2.f32 %v1892_v47 }
 0x331   :  { %v2209_v40 = vpop.eup %2208 }
 0x332   :  { %v565_v46 = vmul.f32 %v2209_v40, %v2207_v39  ;;  %v2211_v49 = vpop.eup %2210  ;;  %v564_v59 = vmul.f32 %v2209_v40, %v2672_v55 }
 0x333   :  { %v477_v50 = vadd.f32 1.0, %v2211_v49 }
 0x334   :  { %567 = vrot.lane.b32.xlu0 %v565_v46, %s2462_s1 }
 0x335   :  { %2212 = vrcp.f32 %v477_v50 }
 0x336   :  { %2214 = vpow2.f32 %v1895_v54 }
 0x33f   :  { %v2213_v51 = vpop.eup %2212 }
 0x340   :  { %v2215_v56 = vpop.eup %2214 }
 0x341   :  { %v561_v58 = vadd.f32 1.0, %v2215_v56 }
 0x343   :  { %2216 = vrcp.f32 %v561_v58 }
 0x34d   :  { %v2217_v62 = vpop.eup %2216 }
 0x387   :  { %v488_v52 = vpop.permute.xlu0 %487 }
 0x388   :  { %v490_v53 = vmul.f32 %v2213_v51, %v488_v52 }
 0x38a   :  { %492 = vrot.lane.b32.xlu1 %v490_v53, %s2467_s14 }
 0x38b   :  { %v483_v57 = vpop.permute.xlu0 %482 }
 0x38c   :  { %v485_v12 = vmul.f32 %v2213_v51, %v483_v57 }
 0x3a6   :  { %v568_v60 = vpop.permute.xlu0 %567 }
 0x3a7   :  { %v2711_v61 = vadd.f32 %v568_v60, %v564_v59 }
 0x3a9   :  { %2218 = vtanh.f32 %v2711_v61 }
 0x3b3   :  { %v2219_v63 = vpop.eup %2218 }
 0x3b4   :  { %v572_v7 = vmul.f32 %v2219_v63, %v2217_v62 }
 0x3b6   :  { %v573_v10 = vpack.c.bf16 %v572_v7, %v572_v7 }
 0x3b8   :  { %575 = vrot.lane.b32.xlu0 %v573_v10, %s2462_s1 }
 0x3fc   :  { %v493_v14 = vpop.permute.xlu1 %492 }
 0x3fd   :  { %v2715_v15 = vadd.f32 %v493_v14, %v485_v12 }
 0x3ff   :  { %2220 = vtanh.f32 %v2715_v15 }
 0x409   :  { %v2221_v16 = vpop.eup %2220 }
 0x40a   :  { %498 = vrot.lane.b32.xlu1 %v2221_v16, %s2462_s1 }
 0x42a   :  { %v576_v55 = vpop.permute.xlu0 %575 }
 0x42b   :  { %2028 = vmatmul.mubr.msk.bf16.vlgmr.msra.gmra.mrb[8].mxu0 %vm69_vm0, %v576_v55 }
 0x42c   :  { %698 = vmatpush1.bf16.msra.mxu0 %v2564_v3  ;;  %729 = vmatprep.mubr.bf16.mxu0 %v2464_v0 }
 0x42d   :  { %699 = vmatprep.subr.bf16.mxu0 %v2570_v4 }
 0x430   :  { %700 = vmatpush1.bf16.msra.mxu0 %v2576_v5 }
 0x431   :  { %701 = vmatprep.subr.bf16.mxu0 %v2582_v6 }
 0x434   :  { %702 = vmatpush1.bf16.msra.mxu0 %v2590_v8 }
 0x435   :  { %703 = vmatprep.subr.bf16.mxu0 %v2595_v9 }
 0x438   :  { %704 = vmatpush1.bf16.msra.mxu0 %v2604_v11 }
 0x439   :  { %2051 = vmatprep.subr.bf16.mxu0 %v2465_v1 }
 0x43b   :  { %1899 = vmatmul.mubr.msk.bf16.vlgmr.msra.gmra.mrb[12].mxu0 %vm69_vm0, %v576_v55 }
 0x43c   :  { %2052 = vmatpush3.bf16.msra.mxu0 %v2628_v42  ;;  %2055 = vmatprep.mubr.msk.bf16.mxu0 %vm2466_vm2, %v2465_v1 }
 0x43d   :  { %2053 = vmatprep.subr.bf16.mxu0 %v2465_v1 }
 0x440   :  { %2054 = vmatpush3.bf16.msra.mxu0 %v2645_v44 }
 0x441   :  { %2059 = vmatprep.subr.bf16.mxu0 %v2465_v1 }
 0x47c   :  { %v499_v17 = vpop.permute.xlu1 %498 }
 0x47d   :  { %v501_v19 = vmul.f32 %v2213_v51, %v499_v17 }
 0x47f   :  { %v502_v20 = vpack.c.bf16 %v501_v19, %v501_v19 }
 0x481   :  { %621 = vrot.lane.b32.xlu1 %v502_v20, %s2467_s14 }
 0x485   :  { %96 = vperm.xlu1 %2171, %v77_v21  }
 0x4f3   :  { %v622_v23 = vpop.permute.xlu1 %621 }
 0x4f4   :  { %2036 = vmatmul.mubr.msk.bf16.vlgmr.msra.gmra.mrb[8].mxu1 %vm72_vm1, %v622_v23 }
 0x4f5   :  { %2040 = vmatpush3.bf16.msra.mxu1 %v2623_v41  ;;  %2047 = vmatprep.mubr.msk.bf16.mxu1 %vm2466_vm2, %v2465_v1 }
 0x4f6   :  { %2041 = vmatprep.subr.bf16.mxu1 %v2465_v1 }
 0x4f9   :  { %2042 = vmatpush3.bf16.msra.mxu1 %v2639_v43 }
 0x4fa   :  { %2043 = vmatprep.subr.bf16.mxu1 %v2465_v1 }
 0x4fd   :  { %2044 = vmatpush3.bf16.msra.mxu1 %v2650_v45 }
 0x4fe   :  { %v614_v24 = vpop.f32.mrb[8].mxu0  ;;  %2045 = vmatprep.subr.bf16.mxu1 %v2465_v1 }
 0x4ff   :  { %v2029_v25 = vpop.f32.mrb[9].mxu0 }
 0x500   :  { %v617_v27 = vpop.f32.mrb[10].mxu0 }
 0x501   :  { %v2030_v28 = vpop.f32.mrb[11].mxu0  ;;  %2046 = vmatpush3.bf16.msra.mxu1 %v2656_v48 }
 0x502   :  { %886 = vmatprep.subr.bf16.mxu1 %v2559_v2 }
 0x504   :  { %v97_v29 = vpop.permute.xlu1 %96 }
 0x505   :  { %v139_v30 = vmul.f32 %v2610_v18, %v97_v29  ;;  %v140_v39 = vmul.f32 %v2616_v26, %v97_v29 }
 0x507   :  { %v167_v31 = vadd.f32 %v2613_v22, %v139_v30  ;;  %v168_v40 = vadd.f32 %v2619_v33, %v140_v39 }
 0x50e   :  { %v731_v32 = vpop.f32.mrb[12].mxu0 }
 0x50f   :  { %v738_v34 = vadd.f32 %v731_v32, %v167_v31  ;;  %v733_v35 = vpop.f32.mrb[13].mxu0 }
 0x510   :  { %v735_v36 = vpop.f32.mrb[14].mxu0  ;;  %v739_v46 = vadd.f32 %v733_v35, %v168_v40 }
 0x511   :  { %v1900_v37 = vmul.f32 -1.442695, %v738_v34  ;;  %v736_v38 = vpop.f32.mrb[15].mxu0 }
 0x512   :  { %v1901_v53 = vmul.f32 -1.442695, %v739_v46 }
 0x513   :  { %2222 = vpow2.f32 %v1900_v37 }
 0x514   :  { %2224 = vtanh.f32 %v739_v46 }
 0x51d   :  { %v2223_v47 = vpop.eup %2222 }
 0x51e   :  { %v743_v49 = vadd.f32 1.0, %v2223_v47  ;;  %v2225_v50 = vpop.eup %2224 }
 0x520   :  { %2226 = vrcp.f32 %v743_v49 }
 0x521   :  { %2228 = vpow2.f32 %v1901_v53 }
 0x52a   :  { %v2227_v51 = vpop.eup %2226 }
 0x52b   :  { %v754_v52 = vmul.f32 %v2227_v51, %v2225_v50  ;;  %v2229_v54 = vpop.eup %2228  ;;  %v753_v57 = vmul.f32 %v2227_v51, %v2711_v61 }
 0x52c   :  { %v750_v56 = vadd.f32 1.0, %v2229_v54 }
 0x52d   :  { %756 = vrot.lane.b32.xlu1 %v754_v52, %s2462_s1 }
 0x52e   :  { %2230 = vrcp.f32 %v750_v56 }
 0x538   :  { %v2231_v60 = vpop.eup %2230 }
 0x59f   :  { %v757_v58 = vpop.permute.xlu1 %756 }
 0x5a0   :  { %v2757_v59 = vadd.f32 %v757_v58, %v753_v57 }
 0x5a2   :  { %2232 = vtanh.f32 %v2757_v59 }
 0x5ac   :  { %v2233_v62 = vpop.eup %2232 }
 0x5ad   :  { %v761_v63 = vmul.f32 %v2233_v62, %v2231_v60 }
 0x5af   :  { %v762_v7 = vpack.c.bf16 %v761_v63, %v761_v63 }
 0x5b1   :  { %764 = vrot.lane.b32.xlu1 %v762_v7, %s2462_s1 }
 0x5c7   :  { %v660_v10 = vpop.f32.mrb[8].mxu1 }
 0x5c8   :  { %v661_v12 = vadd.f32 %v660_v10, %v614_v24  ;;  %v2037_v14 = vpop.f32.mrb[9].mxu1 }
 0x5c9   :  { %v663_v16 = vpop.f32.mrb[10].mxu1 }
 0x5ca   :  { %v666_v55 = vadd.f32 %v2699_v13, %v661_v12  ;;  %v2038_v17 = vpop.f32.mrb[11].mxu1 }
 0x5cc   :  { %2234 = vtanh.f32 %v666_v55  ;;  %v1898_v20 = vmul.f32 -1.442695, %v666_v55 }
 0x5ce   :  { %2236 = vpow2.f32 %v1898_v20 }
 0x5d6   :  { %v2235_v61 = vpop.eup %2234 }
 0x5d7   :  { %676 = vrot.lane.b32.xlu0 %v2235_v61, %s2462_s1 }
 0x5d8   :  { %v2237_v21 = vpop.eup %2236 }
 0x5d9   :  { %v670_v23 = vadd.f32 1.0, %v2237_v21 }
 0x5db   :  { %2238 = vrcp.f32 %v670_v23 }
 0x5e5   :  { %v2239_v24 = vpop.eup %2238 }
 0x5e6   :  { %v674_v28 = vmul.f32 %v2239_v24, %v2715_v15  ;;  %v78_v15 = vld [vmem:[%s3105_s0 + $0x18] sm:$0xff] }
 0x623   :  { %v765_v19 = vpop.permute.xlu1 %764 }
 0x624   :  { %2048 = vmatmul.mubr.msk.bf16.vlgmr.msra.gmra.mrb[12].mxu1 %vm69_vm0, %v765_v19 }
 0x625   :  { %887 = vmatpush1.bf16.msra.mxu1 %v2564_v3  ;;  %918 = vmatprep.mubr.bf16.mxu1 %v2464_v0 }
 0x626   :  { %888 = vmatprep.subr.bf16.mxu1 %v2570_v4 }
 0x629   :  { %889 = vmatpush1.bf16.msra.mxu1 %v2576_v5 }
 0x62a   :  { %890 = vmatprep.subr.bf16.mxu1 %v2582_v6 }
 0x62d   :  { %891 = vmatpush1.bf16.msra.mxu1 %v2590_v8 }
 0x62e   :  { %892 = vmatprep.subr.bf16.mxu1 %v2595_v9 }
 0x631   :  { %893 = vmatpush1.bf16.msra.mxu1 %v2604_v11 }
 0x632   :  { %2071 = vmatprep.subr.bf16.mxu1 %v2465_v1 }
 0x634   :  { %1905 = vmatmul.mubr.msk.bf16.vlgmr.msra.gmra.mrb[16].mxu1 %vm69_vm0, %v765_v19 }
 0x635   :  { %2072 = vmatpush3.bf16.msra.mxu1 %v2628_v42  ;;  %2075 = vmatprep.mubr.msk.bf16.mxu1 %vm2466_vm2, %v2465_v1 }
 0x636   :  { %2073 = vmatprep.subr.bf16.mxu1 %v2465_v1 }
 0x639   :  { %2074 = vmatpush3.bf16.msra.mxu1 %v2645_v44 }
 0x63a   :  { %2079 = vmatprep.subr.bf16.mxu1 %v2465_v1 }
 0x649   :  { %v677_v25 = vpop.permute.xlu0 %676 }
 0x64a   :  { %v679_v27 = vmul.f32 %v2239_v24, %v677_v25 }
 0x64c   :  { %681 = vrot.lane.b32.xlu0 %v679_v27, %s2467_s14 }
 0x6be   :  { %v682_v29 = vpop.permute.xlu0 %681 }
 0x6bf   :  { %v2782_v30 = vadd.f32 %v682_v29, %v674_v28 }
 0x6c1   :  { %2240 = vtanh.f32 %v2782_v30 }
 0x6cb   :  { %v2241_v31 = vpop.eup %2240 }
 0x6cc   :  { %687 = vrot.lane.b32.xlu0 %v2241_v31, %s2462_s1 }
 0x6f7   :  { %v803_v32 = vpop.f32.mrb[12].mxu1 }
 0x6f8   :  { %v2049_v34 = vpop.f32.mrb[13].mxu1 }
 0x6f9   :  { %v806_v35 = vpop.f32.mrb[14].mxu1 }
 0x6fa   :  { %v2050_v36 = vpop.f32.mrb[15].mxu1 }
 0x707   :  { %v920_v37 = vpop.f32.mrb[16].mxu1 }
 0x708   :  { %v922_v38 = vpop.f32.mrb[17].mxu1 }
 0x709   :  { %v924_v39 = vpop.f32.mrb[18].mxu1 }
 0x70a   :  { %v925_v40 = vpop.f32.mrb[19].mxu1 }
 0x73e   :  { %v688_v46 = vpop.permute.xlu0 %687 }
 0x73f   :  { %v690_v47 = vmul.f32 %v2239_v24, %v688_v46 }
 0x741   :  { %v691_v49 = vpack.c.bf16 %v690_v47, %v690_v47 }
 0x743   :  { %810 = vrot.lane.b32.xlu0 %v691_v49, %s2467_s14 }
 0x747   :  { %101 = vperm.xlu0 %2170, %v78_v15  }
 0x7b5   :  { %v811_v50 = vpop.permute.xlu0 %810 }
 0x7b6   :  { %2056 = vmatmul.mubr.msk.bf16.vlgmr.msra.gmra.mrb[16].mxu0 %vm72_vm1, %v811_v50 }
 0x7b7   :  { %2060 = vmatpush3.bf16.msra.mxu0 %v2623_v41  ;;  %2067 = vmatprep.mubr.msk.bf16.mxu0 %vm2466_vm2, %v2465_v1 }
 0x7b8   :  { %2061 = vmatprep.subr.bf16.mxu0 %v2465_v1 }
 0x7bb   :  { %2062 = vmatpush3.bf16.msra.mxu0 %v2639_v43 }
 0x7bc   :  { %2063 = vmatprep.subr.bf16.mxu0 %v2465_v1 }
 0x7bf   :  { %2064 = vmatpush3.bf16.msra.mxu0 %v2650_v45 }
 0x7c0   :  { %2065 = vmatprep.subr.bf16.mxu0 %v2465_v1 }
 0x7c3   :  { %2066 = vmatpush3.bf16.msra.mxu0 %v2656_v48 }
 0x7c4   :  { %1075 = vmatprep.subr.bf16.mxu0 %v2559_v2 }
 0x7c6   :  { %v102_v51 = vpop.permute.xlu0 %101 }
 0x7c7   :  { %v141_v52 = vmul.f32 %v2610_v18, %v102_v51  ;;  %v142_v57 = vmul.f32 %v2616_v26, %v102_v51 }
 0x7c9   :  { %v169_v53 = vadd.f32 %v2613_v22, %v141_v52  ;;  %v170_v58 = vadd.f32 %v2619_v33, %v142_v57 }
 0x7cb   :  { %v927_v54 = vadd.f32 %v920_v37, %v169_v53  ;;  %v928_v60 = vadd.f32 %v922_v38, %v170_v58 }
 0x7cd   :  { %v1906_v56 = vmul.f32 -1.442695, %v927_v54  ;;  %v1907_v14 = vmul.f32 -1.442695, %v928_v60 }
 0x7cf   :  { %2242 = vpow2.f32 %v1906_v56 }
 0x7d0   :  { %2244 = vtanh.f32 %v928_v60 }
 0x7d9   :  { %v2243_v62 = vpop.eup %2242 }
 0x7da   :  { %v932_v63 = vadd.f32 1.0, %v2243_v62  ;;  %v2245_v7 = vpop.eup %2244 }
 0x7dc   :  { %2246 = vrcp.f32 %v932_v63 }
 0x7dd   :  { %2248 = vpow2.f32 %v1907_v14 }
 0x7e6   :  { %v2247_v10 = vpop.eup %2246 }
 0x7e7   :  { %v943_v12 = vmul.f32 %v2247_v10, %v2245_v7  ;;  %v2249_v16 = vpop.eup %2248  ;;  %v942_v17 = vmul.f32 %v2247_v10, %v2757_v59 }
 0x7e8   :  { %v939_v55 = vadd.f32 1.0, %v2249_v16 }
 0x7e9   :  { %945 = vrot.lane.b32.xlu0 %v943_v12, %s2462_s1 }
 0x7ea   :  { %2250 = vrcp.f32 %v939_v55 }
 0x7f4   :  { %v2251_v20 = vpop.eup %2250 }
 0x85b   :  { %v946_v61 = vpop.permute.xlu0 %945 }
 0x85c   :  { %v2807_v19 = vadd.f32 %v946_v61, %v942_v17 }
 0x85e   :  { %2252 = vtanh.f32 %v2807_v19 }
 0x868   :  { %v2253_v21 = vpop.eup %2252 }
 0x869   :  { %v950_v23 = vmul.f32 %v2253_v21, %v2251_v20 }
 0x86b   :  { %v951_v24 = vpack.c.bf16 %v950_v23, %v950_v23 }
 0x86d   :  { %953 = vrot.lane.b32.xlu0 %v951_v24, %s2462_s1 }
 0x889   :  { %v849_v25 = vpop.f32.mrb[16].mxu0 }
 0x88a   :  { %v850_v27 = vadd.f32 %v849_v25, %v803_v32  ;;  %v2057_v28 = vpop.f32.mrb[17].mxu0 }
 0x88b   :  { %v852_v29 = vpop.f32.mrb[18].mxu0 }
 0x88c   :  { %v855_v31 = vadd.f32 %v2699_v13, %v850_v27  ;;  %v2058_v34 = vpop.f32.mrb[19].mxu0 }
 0x88e   :  { %2254 = vtanh.f32 %v855_v31  ;;  %v1904_v32 = vmul.f32 -1.442695, %v855_v31 }
 0x890   :  { %2256 = vpow2.f32 %v1904_v32 }
 0x898   :  { %v2255_v59 = vpop.eup %2254 }
 0x899   :  { %865 = vrot.lane.b32.xlu1 %v2255_v59, %s2462_s1 }
 0x89a   :  { %v2257_v36 = vpop.eup %2256 }
 0x89b   :  { %v859_v37 = vadd.f32 1.0, %v2257_v36 }
 0x89d   :  { %2258 = vrcp.f32 %v859_v37 }
 0x8a7   :  { %v2259_v38 = vpop.eup %2258 }
 0x8a8   :  { %v863_v46 = vmul.f32 %v2259_v38, %v2782_v30  ;;  %v79_v30 = vld [vmem:[%s3105_s0 + $0x20] sm:$0xff] }
 0x8df   :  { %v954_v35 = vpop.permute.xlu0 %953 }
 0x8e0   :  { %2068 = vmatmul.mubr.msk.bf16.vlgmr.msra.gmra.mrb[20].mxu0 %vm69_vm0, %v954_v35 }
 0x8e1   :  { %1076 = vmatpush1.bf16.msra.mxu0 %v2564_v3  ;;  %1107 = vmatprep.mubr.bf16.mxu0 %v2464_v0 }
 0x8e2   :  { %1077 = vmatprep.subr.bf16.mxu0 %v2570_v4 }
 0x8e5   :  { %1078 = vmatpush1.bf16.msra.mxu0 %v2576_v5 }
 0x8e6   :  { %1079 = vmatprep.subr.bf16.mxu0 %v2582_v6 }
 0x8e9   :  { %1080 = vmatpush1.bf16.msra.mxu0 %v2590_v8 }
 0x8ea   :  { %1081 = vmatprep.subr.bf16.mxu0 %v2595_v9 }
 0x8ed   :  { %1082 = vmatpush1.bf16.msra.mxu0 %v2604_v11 }
 0x8ee   :  { %2091 = vmatprep.subr.bf16.mxu0 %v2465_v1 }
 0x8f0   :  { %1911 = vmatmul.mubr.msk.bf16.vlgmr.msra.gmra.mrb[24].mxu0 %vm69_vm0, %v954_v35 }
 0x8f1   :  { %2092 = vmatpush3.bf16.msra.mxu0 %v2628_v42  ;;  %2095 = vmatprep.mubr.msk.bf16.mxu0 %vm2466_vm2, %v2465_v1 }
 0x8f2   :  { %2093 = vmatprep.subr.bf16.mxu0 %v2465_v1 }
 0x8f5   :  { %2094 = vmatpush3.bf16.msra.mxu0 %v2645_v44 }
 0x8f6   :  { %2099 = vmatprep.subr.bf16.mxu0 %v2465_v1 }
 0x90b   :  { %v866_v39 = vpop.permute.xlu1 %865 }
 0x90c   :  { %v868_v40 = vmul.f32 %v2259_v38, %v866_v39 }
 0x90e   :  { %870 = vrot.lane.b32.xlu1 %v868_v40, %s2467_s14 }
 0x980   :  { %v871_v47 = vpop.permute.xlu1 %870 }
 0x981   :  { %v2832_v49 = vadd.f32 %v871_v47, %v863_v46 }
 0x983   :  { %2260 = vtanh.f32 %v2832_v49 }
 0x98d   :  { %v2261_v15 = vpop.eup %2260 }
 0x98e   :  { %876 = vrot.lane.b32.xlu1 %v2261_v15, %s2462_s1 }
 0x9b3   :  { %v992_v50 = vpop.f32.mrb[20].mxu0 }
 0x9b4   :  { %v2069_v51 = vpop.f32.mrb[21].mxu0 }
 0x9b5   :  { %v995_v52 = vpop.f32.mrb[22].mxu0 }
 0x9b6   :  { %v2070_v53 = vpop.f32.mrb[23].mxu0 }
 0x9c3   :  { %v1109_v54 = vpop.f32.mrb[24].mxu0 }
 0x9c4   :  { %v1111_v56 = vpop.f32.mrb[25].mxu0 }
 0x9c5   :  { %v1113_v57 = vpop.f32.mrb[26].mxu0 }
 0x9c6   :  { %v1114_v58 = vpop.f32.mrb[27].mxu0 }
 0xa00   :  { %v877_v60 = vpop.permute.xlu1 %876 }
 0xa01   :  { %v879_v62 = vmul.f32 %v2259_v38, %v877_v60 }
 0xa03   :  { %v880_v63 = vpack.c.bf16 %v879_v62, %v879_v62 }
 0xa05   :  { %999 = vrot.lane.b32.xlu1 %v880_v63, %s2467_s14 }
 0xa09   :  { %106 = vperm.xlu1 %2171, %v79_v30  }
 0xa77   :  { %v1000_v7 = vpop.permute.xlu1 %999 }
 0xa78   :  { %2076 = vmatmul.mubr.msk.bf16.vlgmr.msra.gmra.mrb[20].mxu1 %vm72_vm1, %v1000_v7 }
 0xa79   :  { %2080 = vmatpush3.bf16.msra.mxu1 %v2623_v41  ;;  %2087 = vmatprep.mubr.msk.bf16.mxu1 %vm2466_vm2, %v2465_v1 }
 0xa7a   :  { %2081 = vmatprep.subr.bf16.mxu1 %v2465_v1 }
 0xa7d   :  { %2082 = vmatpush3.bf16.msra.mxu1 %v2639_v43 }
 0xa7e   :  { %2083 = vmatprep.subr.bf16.mxu1 %v2465_v1 }
 0xa81   :  { %2084 = vmatpush3.bf16.msra.mxu1 %v2650_v45 }
 0xa82   :  { %2085 = vmatprep.subr.bf16.mxu1 %v2465_v1 }
 0xa85   :  { %2086 = vmatpush3.bf16.msra.mxu1 %v2656_v48 }
 0xa86   :  { %1264 = vmatprep.subr.bf16.mxu1 %v2559_v2 }
 0xa88   :  { %v107_v10 = vpop.permute.xlu1 %106 }
 0xa89   :  { %v143_v12 = vmul.f32 %v2610_v18, %v107_v10  ;;  %v144_v17 = vmul.f32 %v2616_v26, %v107_v10 }
 0xa8b   :  { %v171_v14 = vadd.f32 %v2613_v22, %v143_v12  ;;  %v172_v61 = vadd.f32 %v2619_v33, %v144_v17  ;;  %v2903_v12 = vld [vmem:[%s3108_s3 + $0x4] ss:$8 sps:$4 sm:$0xff]  }
 0xa8d   :  { %v1116_v16 = vadd.f32 %v1109_v54, %v171_v14  ;;  %v1117_v20 = vadd.f32 %v1111_v56, %v172_v61 }
 0xa8f   :  { %v1912_v55 = vmul.f32 -1.442695, %v1116_v16  ;;  %v1913_v27 = vmul.f32 -1.442695, %v1117_v20 }
 0xa91   :  { %2262 = vpow2.f32 %v1912_v55 }
 0xa92   :  { %2264 = vtanh.f32 %v1117_v20 }
 0xa9b   :  { %v2263_v21 = vpop.eup %2262 }
 0xa9c   :  { %v1121_v23 = vadd.f32 1.0, %v2263_v21  ;;  %v2265_v24 = vpop.eup %2264 }
 0xa9e   :  { %2266 = vrcp.f32 %v1121_v23 }
 0xa9f   :  { %2268 = vpow2.f32 %v1913_v27 }
 0xaa8   :  { %v2267_v25 = vpop.eup %2266 }
 0xaa9   :  { %v1132_v2 = vmul.f32 %v2267_v25, %v2265_v24  ;;  %v2269_v28 = vpop.eup %2268  ;;  %v1131_v31 = vmul.f32 %v2267_v25, %v2807_v19 }
 0xaaa   :  { %v1128_v29 = vadd.f32 1.0, %v2269_v28 }
 0xaab   :  { %1134 = vrot.lane.b32.xlu1 %v1132_v2, %s2462_s1 }
 0xaac   :  { %2270 = vrcp.f32 %v1128_v29 }
 0xab6   :  { %v2271_v35 = vpop.eup %2270 }
 0xb1d   :  { %v1135_v34 = vpop.permute.xlu1 %1134 }
 0xb1e   :  { %v2857_v59 = vadd.f32 %v1135_v34, %v1131_v31 }
 0xb20   :  { %2272 = vtanh.f32 %v2857_v59 }
 0xb2a   :  { %v2273_v32 = vpop.eup %2272 }
 0xb2b   :  { %v1139_v36 = vmul.f32 %v2273_v32, %v2271_v35 }
 0xb2d   :  { %v1140_v37 = vpack.c.bf16 %v1139_v36, %v1139_v36 }
 0xb2f   :  { %1142 = vrot.lane.b32.xlu1 %v1140_v37, %s2462_s1 }
 0xb4b   :  { %v1038_v38 = vpop.f32.mrb[20].mxu1 }
 0xb4c   :  { %v1039_v39 = vadd.f32 %v1038_v38, %v992_v50  ;;  %v2077_v40 = vpop.f32.mrb[21].mxu1 }
 0xb4d   :  { %v1041_v46 = vpop.f32.mrb[22].mxu1 }
 0xb4e   :  { %v1044_v47 = vadd.f32 %v2699_v13, %v1039_v39  ;;  %v2078_v15 = vpop.f32.mrb[23].mxu1 }
 0xb50   :  { %2274 = vtanh.f32 %v1044_v47  ;;  %v1910_v50 = vmul.f32 -1.442695, %v1044_v47 }
 0xb52   :  { %2276 = vpow2.f32 %v1910_v50  ;;  %v2941_v50 = vld [vmem:[%s3108_s3 + $0x24] ss:$8 sps:$4 sm:$0xff]  }
 0xb5a   :  { %v2275_v19 = vpop.eup %2274 }
 0xb5b   :  { %1054 = vrot.lane.b32.xlu0 %v2275_v19, %s2462_s1  ;;  %v2922_v19 = vld [vmem:[%s3108_s3] ss:$8 sps:$4 sm:$0xff]  }
 0xba1   :  { %v1143_v51 = vpop.permute.xlu1 %1142 }
 0xba2   :  { %2088 = vmatmul.mubr.msk.bf16.vlgmr.msra.gmra.mrb[24].mxu1 %vm69_vm0, %v1143_v51 }
 0xba3   :  { %1265 = vmatpush1.bf16.msra.mxu1 %v2564_v3  ;;  %1296 = vmatprep.mubr.bf16.mxu1 %v2464_v0  ;;  %v2277_v3 = vpop.eup %2276 }
 0xba4   :  { %1266 = vmatprep.subr.bf16.mxu1 %v2570_v4  ;;  %v1048_v4 = vadd.f32 1.0, %v2277_v3  ;;  %v2947_v3 = vld [vmem:[%s3108_s3 + $0x20] ss:$8 sps:$4 sm:$0xff]  }
 0xba6   :  { %2278 = vrcp.f32 %v1048_v4  ;;  %v2953_v4 = vld [vmem:[%s3108_s3 + $0x34] ss:$8 sps:$4 sm:$0xff]  }
 0xba7   :  { %1267 = vmatpush1.bf16.msra.mxu1 %v2576_v5 }
 0xba8   :  { %1268 = vmatprep.subr.bf16.mxu1 %v2582_v6 }
 0xbab   :  { %1269 = vmatpush1.bf16.msra.mxu1 %v2590_v8 }
 0xbac   :  { %1270 = vmatprep.subr.bf16.mxu1 %v2595_v9 }
 0xbaf   :  { %1271 = vmatpush1.bf16.msra.mxu1 %v2604_v11 }
 0xbb0   :  { %2111 = vmatprep.subr.bf16.mxu1 %v2465_v1  ;;  %v2279_v5 = vpop.eup %2278 }
 0xbb1   :  { %v1052_v9 = vmul.f32 %v2279_v5, %v2832_v49  ;;  %v80_v49 = vld [vmem:[%s3105_s0 + $0x28] sm:$0xff] }
 0xbb2   :  { %1917 = vmatmul.mubr.msk.bf16.vlgmr.msra.gmra.mrb[28].mxu1 %vm69_vm0, %v1143_v51  ;;  %v2935_v51 = vld [vmem:[%s3108_s3 + $0x10] ss:$8 sps:$4 sm:$0xff]  }
 0xbb3   :  { %2112 = vmatpush3.bf16.msra.mxu1 %v2628_v42  ;;  %2115 = vmatprep.mubr.msk.bf16.mxu1 %vm2466_vm2, %v2465_v1 }
 0xbb4   :  { %2113 = vmatprep.subr.bf16.mxu1 %v2465_v1 }
 0xbb7   :  { %2114 = vmatpush3.bf16.msra.mxu1 %v2645_v44 }
 0xbb8   :  { %2119 = vmatprep.subr.bf16.mxu1 %v2465_v1 }
 0xbcd   :  { %v1055_v6 = vpop.permute.xlu0 %1054 }
 0xbce   :  { %v1057_v8 = vmul.f32 %v2279_v5, %v1055_v6  ;;  %v2959_v6 = vld [vmem:[%s3108_s3 + $0x30] ss:$8 sps:$4 sm:$0xff]  }
 0xbd0   :  { %1059 = vrot.lane.b32.xlu0 %v1057_v8, %s2467_s14  ;;  %v2967_v8 = vld [vmem:[%s3110_s5] sm:$0xff]  }
 0xc42   :  { %v1060_v11 = vpop.permute.xlu0 %1059 }
 0xc43   :  { %v2882_v42 = vadd.f32 %v1060_v11, %v1052_v9  ;;  %v2976_v9 = vld [vmem:[%s3110_s5 + $0x8] sm:$0xff]  }
 0xc45   :  { %2280 = vtanh.f32 %v2882_v42 }
 0xc4f   :  { %v2281_v52 = vpop.eup %2280 }
 0xc50   :  { %1065 = vrot.lane.b32.xlu0 %v2281_v52, %s2462_s1 }
 0xc75   :  { %v1181_v44 = vpop.f32.mrb[24].mxu1 }
 0xc76   :  { %v2089_v53 = vpop.f32.mrb[25].mxu1 }
 0xc77   :  { %v1184_v54 = vpop.f32.mrb[26].mxu1 }
 0xc78   :  { %v2090_v56 = vpop.f32.mrb[27].mxu1 }
 0xc85   :  { %v1298_v57 = vpop.f32.mrb[28].mxu1 }
 0xc86   :  { %v1300_v58 = vpop.f32.mrb[29].mxu1 }
 0xc87   :  { %v1302_v60 = vpop.f32.mrb[30].mxu1 }
 0xc88   :  { %v1303_v62 = vpop.f32.mrb[31].mxu1 }
 0xcc2   :  { %v1066_v63 = vpop.permute.xlu0 %1065 }
 0xcc3   :  { %v1068_v30 = vmul.f32 %v2279_v5, %v1066_v63 }
 0xcc5   :  { %v1069_v7 = vpack.c.bf16 %v1068_v30, %v1068_v30 }
 0xcc7   :  { %1188 = vrot.lane.b32.xlu0 %v1069_v7, %s2467_s14 }
 0xccb   :  { %111 = vperm.xlu0 %2170, %v80_v49  }
 0xd39   :  { %v1189_v10 = vpop.permute.xlu0 %1188 }
 0xd3a   :  { %2096 = vmatmul.mubr.msk.bf16.vlgmr.msra.gmra.mrb[28].mxu0 %vm72_vm1, %v1189_v10 }
 0xd3b   :  { %2100 = vmatpush3.bf16.msra.mxu0 %v2623_v41  ;;  %2107 = vmatprep.mubr.msk.bf16.mxu0 %vm2466_vm2, %v2465_v1 }
 0xd3c   :  { %2101 = vmatprep.subr.bf16.mxu0 %v2465_v1 }
 0xd3f   :  { %2102 = vmatpush3.bf16.msra.mxu0 %v2639_v43 }
 0xd40   :  { %2103 = vmatprep.subr.bf16.mxu0 %v2465_v1 }
 0xd43   :  { %2104 = vmatpush3.bf16.msra.mxu0 %v2650_v45 }
 0xd44   :  { %2105 = vmatprep.subr.bf16.mxu0 %v2465_v1 }
 0xd47   :  { %2106 = vmatpush3.bf16.msra.mxu0 %v2656_v48 }
 0xd48   :  { %1453 = vmatprep.subr.bf16.mxu0 %v2903_v12 }
 0xd4a   :  { %v112_v41 = vpop.permute.xlu0 %111 }
 0xd4b   :  { %v145_v14 = vmul.f32 %v2610_v18, %v112_v41  ;;  %v146_v45 = vmul.f32 %v2616_v26, %v112_v41 }
 0xd4d   :  { %v173_v43 = vadd.f32 %v2613_v22, %v145_v14  ;;  %v174_v17 = vadd.f32 %v2619_v33, %v146_v45 }
 0xd4f   :  { %v1305_v16 = vadd.f32 %v1298_v57, %v173_v43  ;;  %v1306_v48 = vadd.f32 %v1300_v58, %v174_v17  ;;  %v2991_v17 = vld [vmem:[#allocation12] sm:$0xff]  }
 0xd51   :  { %v1918_v55 = vmul.f32 -1.442695, %v1305_v16  ;;  %v1919_v25 = vmul.f32 -1.442695, %v1306_v48 }
 0xd53   :  { %2282 = vpow2.f32 %v1918_v55 }
 0xd54   :  { %2284 = vtanh.f32 %v1306_v48  ;;  %v2997_v48 = vld [vmem:[#allocation12 + $0x8] sm:$0xff]  }
 0xd5d   :  { %v2283_v61 = vpop.eup %2282 }
 0xd5e   :  { %v1310_v20 = vadd.f32 1.0, %v2283_v61  ;;  %v2285_v21 = vpop.eup %2284  ;;  %v3001_v61 = vld [vmem:[#allocation12 + $0x10] sm:$0xff]  }
 0xd60   :  { %2286 = vrcp.f32 %v1310_v20  ;;  %v3005_v20 = vld [vmem:[#allocation12 + $0x18] sm:$0xff]  }
 0xd61   :  { %2288 = vpow2.f32 %v1919_v25 }
 0xd6a   :  { %v2287_v23 = vpop.eup %2286 }
 0xd6b   :  { %v1321_v24 = vmul.f32 %v2287_v23, %v2285_v21  ;;  %v2289_v2 = vpop.eup %2288  ;;  %v1320_v28 = vmul.f32 %v2287_v23, %v2857_v59 }
 0xd6c   :  { %v1317_v27 = vadd.f32 1.0, %v2289_v2 }
 0xd6d   :  { %1323 = vrot.lane.b32.xlu0 %v1321_v24, %s2462_s1 }
 0xd6e   :  { %2290 = vrcp.f32 %v1317_v27 }
 0xd78   :  { %v2291_v34 = vpop.eup %2290 }
 0xddf   :  { %v1324_v29 = vpop.permute.xlu0 %1323 }
 0xde0   :  { %v2912_v31 = vadd.f32 %v1324_v29, %v1320_v28 }
 0xde2   :  { %2292 = vtanh.f32 %v2912_v31 }
 0xdec   :  { %v2293_v35 = vpop.eup %2292 }
 0xded   :  { %v1328_v32 = vmul.f32 %v2293_v35, %v2291_v34 }
 0xdef   :  { %v1329_v36 = vpack.c.bf16 %v1328_v32, %v1328_v32 }
 0xdf1   :  { %1331 = vrot.lane.b32.xlu0 %v1329_v36, %s2462_s1 }
 0xe0d   :  { %v1227_v37 = vpop.f32.mrb[28].mxu0 }
 0xe0e   :  { %v1228_v38 = vadd.f32 %v1227_v37, %v1181_v44  ;;  %v2097_v39 = vpop.f32.mrb[29].mxu0 }
 0xe0f   :  { %v1230_v40 = vpop.f32.mrb[30].mxu0 }
 0xe10   :  { %v1233_v46 = vadd.f32 %v2699_v13, %v1228_v38  ;;  %v2098_v47 = vpop.f32.mrb[31].mxu0  ;;  %v2929_v13 = vld [vmem:[%s3108_s3 + $0x14] ss:$8 sps:$4 sm:$0xff]  }
 0xe12   :  { %2294 = vtanh.f32 %v1233_v46  ;;  %v1916_v5 = vmul.f32 -1.442695, %v1233_v46 }
 0xe14   :  { %2296 = vpow2.f32 %v1916_v5 }
 0xe1c   :  { %v2295_v59 = vpop.eup %2294 }
 0xe1d   :  { %1243 = vrot.lane.b32.xlu1 %v2295_v59, %s2462_s1 }
 0xe1e   :  { %v2297_v11 = vpop.eup %2296 }
 0xe1f   :  { %v1237_v52 = vadd.f32 1.0, %v2297_v11 }
 0xe21   :  { %2298 = vrcp.f32 %v1237_v52 }
 0xe2b   :  { %v2299_v44 = vpop.eup %2298 }
 0xe2c   :  { %v1241_v56 = vmul.f32 %v2299_v44, %v2882_v42  ;;  %v81_v42 = vld [vmem:[%s3105_s0 + $0x30] sm:$0xff] }
 0xe63   :  { %v1332_v15 = vpop.permute.xlu0 %1331 }
 0xe64   :  { %2108 = vmatmul.mubr.msk.bf16.vlgmr.msra.gmra.mrb[32].mxu0 %vm69_vm0, %v1332_v15 }
 0xe65   :  { %1454 = vmatpush1.bf16.msra.mxu0 %v2922_v19  ;;  %1485 = vmatprep.mubr.bf16.mxu0 %v2464_v0 }
 0xe66   :  { %1455 = vmatprep.subr.bf16.mxu0 %v2929_v13 }
 0xe69   :  { %1456 = vmatpush1.bf16.msra.mxu0 %v2935_v51 }
 0xe6a   :  { %1457 = vmatprep.subr.bf16.mxu0 %v2941_v50 }
 0xe6d   :  { %1458 = vmatpush1.bf16.msra.mxu0 %v2947_v3 }
 0xe6e   :  { %1459 = vmatprep.subr.bf16.mxu0 %v2953_v4 }
 0xe71   :  { %1460 = vmatpush1.bf16.msra.mxu0 %v2959_v6 }
 0xe72   :  { %2131 = vmatprep.subr.bf16.mxu0 %v2465_v1 }
 0xe74   :  { %1923 = vmatmul.mubr.msk.bf16.vlgmr.msra.gmra.mrb[36].mxu0 %vm69_vm0, %v1332_v15 }
 0xe75   :  { %2132 = vmatpush3.bf16.msra.mxu0 %v2967_v8  ;;  %2135 = vmatprep.mubr.msk.bf16.mxu0 %vm2466_vm2, %v2465_v1 }
 0xe76   :  { %2133 = vmatprep.subr.bf16.mxu0 %v2465_v1 }
 0xe79   :  { %2134 = vmatpush3.bf16.msra.mxu0 %v2976_v9 }
 0xe7a   :  { %2139 = vmatprep.subr.bf16.mxu0 %v2465_v1 }
 0xe8f   :  { %v1244_v53 = vpop.permute.xlu1 %1243 }
 0xe90   :  { %v1246_v54 = vmul.f32 %v2299_v44, %v1244_v53 }
 0xe92   :  { %1248 = vrot.lane.b32.xlu1 %v1246_v54, %s2467_s14 }
 0xf04   :  { %v1249_v57 = vpop.permute.xlu1 %1248 }
 0xf05   :  { %v2982_v58 = vadd.f32 %v1249_v57, %v1241_v56 }
 0xf07   :  { %2300 = vtanh.f32 %v2982_v58 }
 0xf11   :  { %v2301_v60 = vpop.eup %2300 }
 0xf12   :  { %1254 = vrot.lane.b32.xlu1 %v2301_v60, %s2462_s1 }
 0xf37   :  { %v1370_v62 = vpop.f32.mrb[32].mxu0 }
 0xf38   :  { %v2109_v63 = vpop.f32.mrb[33].mxu0 }
 0xf39   :  { %v1373_v30 = vpop.f32.mrb[34].mxu0 }
 0xf3a   :  { %v2110_v7 = vpop.f32.mrb[35].mxu0 }
 0xf47   :  { %v1487_v49 = vpop.f32.mrb[36].mxu0 }
 0xf48   :  { %v1489_v10 = vpop.f32.mrb[37].mxu0 }
 0xf49   :  { %v1491_v41 = vpop.f32.mrb[38].mxu0 }
 0xf4a   :  { %v1492_v14 = vpop.f32.mrb[39].mxu0 }
 0xf84   :  { %v1255_v43 = vpop.permute.xlu1 %1254 }
 0xf85   :  { %v1257_v16 = vmul.f32 %v2299_v44, %v1255_v43 }
 0xf87   :  { %v1258_v55 = vpack.c.bf16 %v1257_v16, %v1257_v16 }
 0xf89   :  { %1377 = vrot.lane.b32.xlu1 %v1258_v55, %s2467_s14 }
 0xf8d   :  { %116 = vperm.xlu1 %2171, %v81_v42  }
 0xffb   :  { %v1378_v45 = vpop.permute.xlu1 %1377 }
 0xffc   :  { %2116 = vmatmul.mubr.msk.bf16.vlgmr.msra.gmra.mrb[32].mxu1 %vm72_vm1, %v1378_v45 }
 0xffd   :  { %2120 = vmatpush3.bf16.msra.mxu1 %v2991_v17  ;;  %2127 = vmatprep.mubr.msk.bf16.mxu1 %vm2466_vm2, %v2465_v1 }
 0xffe   :  { %2121 = vmatprep.subr.bf16.mxu1 %v2465_v1 }
0x1001   :  { %2122 = vmatpush3.bf16.msra.mxu1 %v2997_v48 }
0x1002   :  { %2123 = vmatprep.subr.bf16.mxu1 %v2465_v1 }
0x1005   :  { %2124 = vmatpush3.bf16.msra.mxu1 %v3001_v61 }
0x1006   :  { %2125 = vmatprep.subr.bf16.mxu1 %v2465_v1 }
0x1009   :  { %2126 = vmatpush3.bf16.msra.mxu1 %v3005_v20 }
0x100a   :  { %1642 = vmatprep.subr.bf16.mxu1 %v2903_v12 }
0x100c   :  { %v117_v21 = vpop.permute.xlu1 %116 }
0x100d   :  { %v147_v23 = vmul.f32 %v2610_v18, %v117_v21  ;;  %v148_v27 = vmul.f32 %v2616_v26, %v117_v21 }
0x100f   :  { %v175_v24 = vadd.f32 %v2613_v22, %v147_v23  ;;  %v176_v28 = vadd.f32 %v2619_v33, %v148_v27 }
0x1011   :  { %v1494_v25 = vadd.f32 %v1487_v49, %v175_v24  ;;  %v1495_v29 = vadd.f32 %v1489_v10, %v176_v28 }
0x1013   :  { %v1924_v2 = vmul.f32 -1.442695, %v1494_v25  ;;  %v1925_v37 = vmul.f32 -1.442695, %v1495_v29 }
0x1015   :  { %2302 = vpow2.f32 %v1924_v2 }
0x1016   :  { %2304 = vtanh.f32 %v1495_v29 }
0x101f   :  { %v2303_v34 = vpop.eup %2302 }
0x1020   :  { %v1499_v35 = vadd.f32 1.0, %v2303_v34  ;;  %v2305_v32 = vpop.eup %2304 }
0x1022   :  { %2306 = vrcp.f32 %v1499_v35 }
0x1023   :  { %2308 = vpow2.f32 %v1925_v37 }
0x102c   :  { %v2307_v36 = vpop.eup %2306 }
0x102d   :  { %v1510_v12 = vmul.f32 %v2307_v36, %v2305_v32  ;;  %v2309_v38 = vpop.eup %2308  ;;  %v1509_v40 = vmul.f32 %v2307_v36, %v2912_v31  ;;  %v3022_v31 = vld [vmem:[%s3111_s6] ss:$0 sm:$0xff] }
0x102e   :  { %v1506_v39 = vadd.f32 1.0, %v2309_v38 }
0x102f   :  { %1512 = vrot.lane.b32.xlu1 %v1510_v12, %s2462_s1 }
0x1030   :  { %2310 = vrcp.f32 %v1506_v39 }
0x103a   :  { %v2311_v59 = vpop.eup %2310 }
0x10a1   :  { %v1513_v46 = vpop.permute.xlu1 %1512 }
0x10a2   :  { %v3015_v47 = vadd.f32 %v1513_v46, %v1509_v40 }
0x10a4   :  { %2312 = vtanh.f32 %v3015_v47 }
0x10ae   :  { %v2313_v15 = vpop.eup %2312 }
0x10af   :  { %v1517_v5 = vmul.f32 %v2313_v15, %v2311_v59 }
0x10b1   :  { %v1518_v11 = vpack.c.bf16 %v1517_v5, %v1517_v5 }
0x10b3   :  { %1520 = vrot.lane.b32.xlu1 %v1518_v11, %s2462_s1 }
0x10cf   :  { %v1416_v52 = vpop.f32.mrb[32].mxu1 }
0x10d0   :  { %v1417_v44 = vadd.f32 %v1416_v52, %v1370_v62  ;;  %v2117_v53 = vpop.f32.mrb[33].mxu1 }
0x10d1   :  { %v1419_v54 = vpop.f32.mrb[34].mxu1 }
0x10d2   :  { %v1422_v56 = vadd.f32 %v3022_v31, %v1417_v44  ;;  %v2118_v57 = vpop.f32.mrb[35].mxu1 }
0x10d4   :  { %2314 = vtanh.f32 %v1422_v56  ;;  %v1922_v62 = vmul.f32 -1.442695, %v1422_v56 }
0x10d6   :  { %2316 = vpow2.f32 %v1922_v62 }
0x10de   :  { %v2315_v60 = vpop.eup %2314 }
0x10df   :  { %1432 = vrot.lane.b32.xlu0 %v2315_v60, %s2462_s1 }
0x1125   :  { %v1521_v63 = vpop.permute.xlu1 %1520 }
0x1126   :  { %2128 = vmatmul.mubr.msk.bf16.vlgmr.msra.gmra.mrb[36].mxu1 %vm69_vm0, %v1521_v63 }
0x1127   :  { %1643 = vmatpush1.bf16.msra.mxu1 %v2922_v19  ;;  %1674 = vmatprep.mubr.bf16.mxu1 %v2464_v0  ;;  %v2317_v0 = vpop.eup %2316 }
0x1128   :  { %1644 = vmatprep.subr.bf16.mxu1 %v2929_v13  ;;  %v1426_v19 = vadd.f32 1.0, %v2317_v0 }
0x112a   :  { %2318 = vrcp.f32 %v1426_v19 }
0x112b   :  { %1645 = vmatpush1.bf16.msra.mxu1 %v2935_v51 }
0x112c   :  { %1646 = vmatprep.subr.bf16.mxu1 %v2941_v50 }
0x112f   :  { %1647 = vmatpush1.bf16.msra.mxu1 %v2947_v3 }
0x1130   :  { %1648 = vmatprep.subr.bf16.mxu1 %v2953_v4 }
0x1133   :  { %1649 = vmatpush1.bf16.msra.mxu1 %v2959_v6 }
0x1134   :  { %2151 = vmatprep.subr.bf16.mxu1 %v2465_v1  ;;  %v2319_v13 = vpop.eup %2318 }
0x1135   :  { %v1430_v3 = vmul.f32 %v2319_v13, %v2982_v58  ;;  %v82_v58 = vld [vmem:[%s3105_s0 + $0x38] sm:$0xff]  ;;  %s2468_s0 = smov 96  }
0x1136   :  { %1929 = vmatmul.mubr.msk.bf16.vlgmr.msra.gmra.mrb[40].mxu1 %vm69_vm0, %v1521_v63 }
0x1137   :  { %2152 = vmatpush3.bf16.msra.mxu1 %v2967_v8  ;;  %2155 = vmatprep.mubr.msk.bf16.mxu1 %vm2466_vm2, %v2465_v1 }
0x1138   :  { %2153 = vmatprep.subr.bf16.mxu1 %v2465_v1 }
0x113b   :  { %2154 = vmatpush3.bf16.msra.mxu1 %v2976_v9 }
0x1151   :  { %v1433_v51 = vpop.permute.xlu0 %1432 }
0x1152   :  { %v1435_v50 = vmul.f32 %v2319_v13, %v1433_v51 }
0x1154   :  { %1437 = vrot.lane.b32.xlu0 %v1435_v50, %s2467_s14 }
0x11c6   :  { %v1438_v4 = vpop.permute.xlu0 %1437 }
0x11c7   :  { %v3044_v6 = vadd.f32 %v1438_v4, %v1430_v3 }
0x11c9   :  { %2320 = vtanh.f32 %v3044_v6 }
0x11d3   :  { %v2321_v8 = vpop.eup %2320 }
0x11d4   :  { %1443 = vrot.lane.b32.xlu0 %v2321_v8, %s2462_s1 }
0x11f9   :  { %v1559_v30 = vpop.f32.mrb[36].mxu1 }
0x11fa   :  { %v2129_v9 = vpop.f32.mrb[37].mxu1 }
0x11fb   :  { %v1562_v7 = vpop.f32.mrb[38].mxu1 }
0x11fc   :  { %v2130_v49 = vpop.f32.mrb[39].mxu1 }
0x1209   :  { %v1676_v10 = vpop.f32.mrb[40].mxu1 }
0x120a   :  { %v1678_v41 = vpop.f32.mrb[41].mxu1 }
0x120b   :  { %v1680_v14 = vpop.f32.mrb[42].mxu1 }
0x120c   :  { %v1681_v43 = vpop.f32.mrb[43].mxu1 }
0x1246   :  { %v1444_v16 = vpop.permute.xlu0 %1443 }
0x1247   :  { %v1446_v55 = vmul.f32 %v2319_v13, %v1444_v16 }
0x1249   :  { %v1447_v42 = vpack.c.bf16 %v1446_v55, %v1446_v55 }
0x124b   :  { %1566 = vrot.lane.b32.xlu0 %v1447_v42, %s2467_s14 }
0x124f   :  { %121 = vperm.xlu0 %2170, %v82_v58  }
0x12bd   :  { %v1567_v45 = vpop.permute.xlu0 %1566 }
0x12be   :  { %2136 = vmatmul.mubr.msk.bf16.vlgmr.msra.gmra.mrb[40].mxu0 %vm72_vm1, %v1567_v45 }
0x12bf   :  { %2140 = vmatpush3.bf16.msra.mxu0 %v2991_v17  ;;  %2147 = vmatprep.mubr.msk.bf16.mxu0 %vm2466_vm2, %v2465_v1 }
0x12c0   :  { %2141 = vmatprep.subr.bf16.mxu0 %v2465_v1 }
0x12c3   :  { %2142 = vmatpush3.bf16.msra.mxu0 %v2997_v48 }
0x12c4   :  { %2143 = vmatprep.subr.bf16.mxu0 %v2465_v1 }
0x12c7   :  { %2144 = vmatpush3.bf16.msra.mxu0 %v3001_v61 }
0x12c8   :  { %2145 = vmatprep.subr.bf16.mxu0 %v2465_v1 }
0x12cb   :  { %2146 = vmatpush3.bf16.msra.mxu0 %v3005_v20 }
0x12ce   :  { %v122_v21 = vpop.permute.xlu0 %121 }
0x12cf   :  { %v149_v23 = vmul.f32 %v2610_v18, %v122_v21  ;;  %v150_v2 = vmul.f32 %v2616_v26, %v122_v21 }
0x12d1   :  { %v177_v17 = vadd.f32 %v2613_v22, %v149_v23  ;;  %v178_v48 = vadd.f32 %v2619_v33, %v150_v2 }
0x12d3   :  { %v1683_v24 = vadd.f32 %v1676_v10, %v177_v17  ;;  %v1684_v27 = vadd.f32 %v1678_v41, %v178_v48 }
0x12d5   :  { %v1930_v25 = vmul.f32 -1.442695, %v1683_v24  ;;  %v1931_v18 = vmul.f32 -1.442695, %v1684_v27 }
0x12d7   :  { %2322 = vpow2.f32 %v1930_v25 }
0x12d8   :  { %2324 = vtanh.f32 %v1684_v27 }
0x12e1   :  { %v2323_v28 = vpop.eup %2322 }
0x12e2   :  { %v1688_v29 = vadd.f32 1.0, %v2323_v28  ;;  %v2325_v1 = vpop.eup %2324 }
0x12e4   :  { %2326 = vrcp.f32 %v1688_v29 }
0x12e5   :  { %2328 = vpow2.f32 %v1931_v18 }
0x12ee   :  { %v2327_v61 = vpop.eup %2326 }
0x12ef   :  { %v1699_v20 = vmul.f32 %v2327_v61, %v2325_v1  ;;  %v2329_v22 = vpop.eup %2328  ;;  %v1698_v35 = vmul.f32 %v2327_v61, %v3015_v47 }
0x12f0   :  { %v1695_v34 = vadd.f32 1.0, %v2329_v22 }
0x12f1   :  { %1701 = vrot.lane.b32.xlu0 %v1699_v20, %s2462_s1 }
0x12f2   :  { %2330 = vrcp.f32 %v1695_v34 }
0x12fc   :  { %v2331_v33 = vpop.eup %2330 }
0x1363   :  { %v1702_v26 = vpop.permute.xlu0 %1701 }
0x1364   :  { %v3068_v32 = vadd.f32 %v1702_v26, %v1698_v35 }
0x1366   :  { %2332 = vtanh.f32 %v3068_v32 }
0x1370   :  { %v2333_v36 = vpop.eup %2332 }
0x1371   :  { %v1706_v12 = vmul.f32 %v2333_v36, %v2331_v33 }
0x1373   :  { %v1707_v37 = vpack.c.bf16 %v1706_v12, %v1706_v12 }
0x1375   :  { %1709 = vrot.lane.b32.xlu0 %v1707_v37, %s2462_s1 }
0x1391   :  { %v1605_v38 = vpop.f32.mrb[40].mxu0 }
0x1392   :  { %v1606_v39 = vadd.f32 %v1605_v38, %v1559_v30  ;;  %v2137_v40 = vpop.f32.mrb[41].mxu0 }
0x1393   :  { %v1608_v46 = vpop.f32.mrb[42].mxu0 }
0x1394   :  { %v1611_v59 = vadd.f32 %v3022_v31, %v1606_v39  ;;  %v2138_v15 = vpop.f32.mrb[43].mxu0 }
0x1396   :  { %2334 = vtanh.f32 %v1611_v59  ;;  %v1928_v11 = vmul.f32 -1.442695, %v1611_v59 }
0x1398   :  { %2336 = vpow2.f32 %v1928_v11 }
0x13a0   :  { %v2335_v47 = vpop.eup %2334 }
0x13a1   :  { %1621 = vrot.lane.b32.xlu1 %v2335_v47, %s2462_s1 }
0x13a2   :  { %v2337_v52 = vpop.eup %2336 }
0x13a3   :  { %v1615_v44 = vadd.f32 1.0, %v2337_v52 }
0x13a5   :  { %2338 = vrcp.f32 %v1615_v44 }
0x13af   :  { %v2339_v53 = vpop.eup %2338 }
0x13b0   :  { %v1619_v57 = vmul.f32 %v2339_v53, %v3044_v6 }
0x13e7   :  { %v1710_v5 = vpop.permute.xlu0 %1709 }
0x13e8   :  { %2148 = vmatmul.mubr.msk.bf16.vlgmr.msra.gmra.mrb[44].mxu0 %vm69_vm0, %v1710_v5 }
0x1413   :  { %v1622_v54 = vpop.permute.xlu1 %1621 }
0x1414   :  { %v1624_v56 = vmul.f32 %v2339_v53, %v1622_v54 }
0x1416   :  { %1626 = vrot.lane.b32.xlu1 %v1624_v56, %s2467_s14 }
0x1488   :  { %v1627_v60 = vpop.permute.xlu1 %1626 }
0x1489   :  { %v1629_v63 = vadd.f32 %v1627_v60, %v1619_v57 }
0x148b   :  { %2340 = vtanh.f32 %v1629_v63 }
0x1495   :  { %v2341_v62 = vpop.eup %2340 }
0x1496   :  { %1632 = vrot.lane.b32.xlu1 %v2341_v62, %s2462_s1 }
0x14bb   :  { %v1748_v0 = vpop.f32.mrb[44].mxu0 }
0x14bc   :  { %v2149_v19 = vpop.f32.mrb[45].mxu0 }
0x14bd   :  { %v1751_v13 = vpop.f32.mrb[46].mxu0 }
0x14be   :  { %v2150_v51 = vpop.f32.mrb[47].mxu0 }
0x1508   :  { %v1633_v50 = vpop.permute.xlu1 %1632 }
0x1509   :  { %v1635_v3 = vmul.f32 %v2339_v53, %v1633_v50 }
0x150b   :  { %v1636_v4 = vpack.c.bf16 %v1635_v3, %v1635_v3 }
0x150d   :  { %1755 = vrot.lane.b32.xlu1 %v1636_v4, %s2467_s14 }
0x157f   :  { %v1756_v8 = vpop.permute.xlu1 %1755 }
0x1580   :  { %2156 = vmatmul.mubr.msk.bf16.vlgmr.msra.gmra.mrb[44].mxu1 %vm72_vm1, %v1756_v8 }
0x1653   :  { %v1794_v30 = vpop.f32.mrb[44].mxu1 }
0x1654   :  { %v1795_v6 = vadd.f32 %v1794_v30, %v1748_v0  ;;  %v2157_v9 = vpop.f32.mrb[45].mxu1 }
0x1655   :  { %v1797_v7 = vpop.f32.mrb[46].mxu1 }
0x1656   :  { %v1800_v49 = vadd.f32 %v3022_v31, %v1795_v6  ;;  %v2158_v10 = vpop.f32.mrb[47].mxu1 }
0x1658   :  { %2342 = vtanh.f32 %v1800_v49  ;;  %v1934_v14 = vmul.f32 -1.442695, %v1800_v49 }
0x165a   :  { %2344 = vpow2.f32 %v1934_v14 }
0x1662   :  { %v2343_v41 = vpop.eup %2342 }
0x1663   :  { %1810 = vrot.lane.b32.xlu0 %v2343_v41, %s2462_s1 }
0x1664   :  { %v2345_v43 = vpop.eup %2344 }
0x1665   :  { %v1804_v16 = vadd.f32 1.0, %v2345_v43 }
0x1667   :  { %2346 = vrcp.f32 %v1804_v16 }
0x1671   :  { %v2347_v55 = vpop.eup %2346 }
0x1672   :  { %v1808_v45 = vmul.f32 %v2347_v55, %v1629_v63 }
0x16d5   :  { %v1811_v42 = vpop.permute.xlu0 %1810 }
0x16d6   :  { %v1813_v58 = vmul.f32 %v2347_v55, %v1811_v42 }
0x16d8   :  { %1815 = vrot.lane.b32.xlu1 %v1813_v58, %s2467_s14 }
0x174a   :  { %v1816_v21 = vpop.permute.xlu1 %1815 }
0x174b   :  { %v1818_v23 = vadd.f32 %v1816_v21, %v1808_v45 }
0x174d   :  { %2348 = vtanh.f32 %v1818_v23 }
0x1757   :  { %v2349_v31 = vpop.eup %2348 }
0x1758   :  { %1821 = vrot.lane.b32.xlu0 %v2349_v31, %s2462_s1 }
0x175c   :  { %1826 = vrot.lane.b32.xlu0 %v1706_v12, %s2462_s1 }
0x1760   :  { %1841 = vrot.lane.b32.xlu0 %v1818_v23, %s2468_s0 }
0x17ca   :  { %v1822_v17 = vpop.permute.xlu0 %1821 }
0x17cb   :  { %v1824_v24 = vmul.f32 %v2347_v55, %v1822_v17 }
0x17cd   :  { %1836 = vrot.lane.b32.xlu1 %v1824_v24, %s2467_s14 }
0x17ce   :  { %v1827_v25 = vpop.permute.xlu0 %1826 }
0x17cf   :  { %1829 = vst.msk [vmem:[#allocation3] sm:$0xff] %vm69_vm0, %v1827_v25 }
0x17d1   :  { %1831 = vrot.lane.b32.xlu1 %v3068_v32, %s2462_s1 }
0x17d2   :  { %v1842_v2 = vpop.permute.xlu0 %1841 }
0x17d3   :  { %1844 = vst.msk [vmem:[#allocation6] sm:$0xff] %vm72_vm1, %v1842_v2 }
0x183f   :  { %v1837_v48 = vpop.permute.xlu1 %1836 }
0x1840   :  { %1839 = vst.msk [vmem:[#allocation5] sm:$0xff] %vm72_vm1, %v1837_v48  ;;  %1848 = vst.msk [vmem:[#allocation13] sm:$0xff] %vm72_vm1, %v1837_v48 }
0x1841   :  { %2442 = shalt.err (!%p2439_p0)
}
0x1842   :  { %s2443_s24 = scalar_lea.hbm %s3112_s7, 128 }
0x1843   :  { %p2444_p1 = scmp.ne.s32.totalorder %s3112_s7, %s2443_s24  ;;  %p2447_p2 = scmp.lt.u32.totalorder %s2443_s24, %s3112_s7 }
0x1845   :  { %p2449_p3 = pnand %p2447_p2, %p2444_p1 }
0x1847   :  { %2452 = shalt.err (!%p2449_p3)
}
0x1848   :  { %1858 = dma.vmem_to_hbm [thread:$0]  %s1856_s2, 128, %s3112_s7, [#allocation9]   ;;  %v1832_v27 = vpop.permute.xlu1 %1831 }
0x1849   :  { %1834 = vst.msk [vmem:[#allocation4] sm:$0xff] %vm69_vm0, %v1832_v27 }
0x184a   :  { %2457 = dma.done.wait [#allocation9], 128  }
0x184b   :  { %2458 = vsyncadd [#allocation9], 4294967168 }
0x184c   :  { %1862 = vsyncpa [#allocation8], 1 }
0x184d   :  { %1863 = vsyncpa [#allocation11], 1 }
0x184e   :  { %1864 = vsyncpa [#allocation9], 1 }

</bundles_post_ra>
